<compile_context>
chip_gen: v6e
topology: v6e:2x2x1
jax: 0.10.0
libtpu: 0.0.40
codegen_flags: <defaults>
</compile_context>

<pallas_src>
import functools

import numpy as np
import jax
import jax.numpy as jnp
from jax import lax
from jax.experimental import pallas as pl
from jax.experimental.pallas import tpu as pltpu

LN_EPS = 1e-12


# ------------------------------- Pallas kernel ------------------------------ #

def _layernorm(h, gamma, beta):
    mu = jnp.mean(h, axis=-1, keepdims=True)
    var = jnp.mean((h - mu) ** 2, axis=-1, keepdims=True)
    return (h - mu) * lax.rsqrt(var + LN_EPS) * gamma + beta


def _encoder_kernel(x_ref, m_ref, pos_ref, g0_ref, b0_ref,
                    wqkv_ref, bqkv_ref, wo_ref, bo_ref, g_ref, b_ref,
                    o_ref, *, n_layers, n_head, d_k, d_v):
    # Per-batch block. Shapes (batch dim squeezed by BlockSpec):
    #   x_ref: (L, D) f32          m_ref: (L, L) f32        pos_ref: (L, D) f32
    #   g0_ref/b0_ref: (1, D) f32
    #   wqkv_ref: (n_layers, D, H*(2*dk+dv)) f32   bqkv_ref: (n_layers, 1, H*(2*dk+dv)) f32
    #   wo_ref:   (n_layers, H*dv, D) f32          bo_ref/g_ref/b_ref: (n_layers, 1, D) f32
    L, D = x_ref.shape
    hk = n_head * d_k

    # enc = LayerNorm(src + PositionalEncoding(src)) = LN(2*src + pos_table[:L])
    enc = _layernorm(2.0 * x_ref[...] + pos_ref[...], g0_ref[...], b0_ref[...])

    # Additive attention mask broadcast over heads once (hoisted out of the layer loop).
    mask_h = jnp.broadcast_to(m_ref[...][None, :, :], (n_head, L, L))

    for l in range(n_layers):          # static unroll; weights stay resident in VMEM
        residual = enc

        # Fused QKV projection (1/sqrt(d_k) already folded into the Q weight/bias).
        qkv = jnp.dot(enc, wqkv_ref[l], preferred_element_type=jnp.float32) + bqkv_ref[l]
        q = qkv[:, :hk]
        k = qkv[:, hk:2 * hk]
        v = qkv[:, 2 * hk:]

        # Per-head scores, stacked on a leading head axis -> ONE softmax pass for all heads.
        # q @ k^T via dot_general contracting the last axes (no transpose materialized).
        s = jnp.stack(
            [lax.dot_general(q[:, h * d_k:(h + 1) * d_k],
                             k[:, h * d_k:(h + 1) * d_k],
                             (((1,), (1,)), ((), ())),
                             preferred_element_type=jnp.float32)
             for h in range(n_head)], axis=0) + mask_h            # (H, L, L)
        s = s - jnp.max(s, axis=-1, keepdims=True)
        e = jnp.exp(s)
        # Exact divide for parity with F.softmax; use pl.reciprocal(..., approx=True)
        # to offload to the EUP slot if bit-level parity is not required.
        p = e / jnp.sum(e, axis=-1, keepdims=True)                 # (H, L, L)

        # attn @ V per head, lane-concatenated -> single output-projection matmul.
        o_heads = jnp.concatenate(
            [jnp.dot(p[h], v[:, h * d_v:(h + 1) * d_v],
                     preferred_element_type=jnp.float32)
             for h in range(n_head)], axis=1)                      # (L, H*dv)
        out = jnp.dot(o_heads, wo_ref[l],
                      preferred_element_type=jnp.float32) + bo_ref[l]

        # Residual add + LayerNorm (f32 statistics).
        enc = _layernorm(out + residual, g_ref[l], b_ref[l])

    o_ref[...] = enc


# ------------------------------ Pallas wrapper ------------------------------ #

def _full_spec(a):
    nd = a.ndim
    return pl.BlockSpec(a.shape, lambda b: (0,) * nd)


def tonn_encoder(src_seq, src_mask, params, *, n_head, d_k, d_v, n_layers):
    B, L, D = src_seq.shape
    pos = params["pos_table"][:L]                                  # (L, D)
    kernel = functools.partial(_encoder_kernel, n_layers=n_layers,
                               n_head=n_head, d_k=d_k, d_v=d_v)
    return pl.pallas_call(
        kernel,
        grid=(B,),
        in_specs=[
            pl.BlockSpec((None, L, D), lambda b: (b, 0, 0)),       # x (per-batch block)
            pl.BlockSpec((None, L, L), lambda b: (b, 0, 0)),       # mask (per-batch block)
            _full_spec(pos),
            _full_spec(params["ln0_g"]),
            _full_spec(params["ln0_b"]),
            _full_spec(params["wqkv"]),
            _full_spec(params["bqkv"]),
            _full_spec(params["wo"]),
            _full_spec(params["bo"]),
            _full_spec(params["ln_g"]),
            _full_spec(params["ln_b"]),
        ],
        out_specs=pl.BlockSpec((None, L, D), lambda b: (b, 0, 0)),
        out_shape=jax.ShapeDtypeStruct((B, L, D), jnp.float32),
        compiler_params=pltpu.CompilerParams(dimension_semantics=("parallel",)),
    )(src_seq, src_mask, pos,
      params["ln0_g"], params["ln0_b"],
      params["wqkv"], params["bqkv"], params["wo"], params["bo"],
      params["ln_g"], params["ln_b"])


# ------------------------------ Model assembly ------------------------------ #

def sinusoid_table(n_position, d_hid):
    def angle_vec(pos):
        return [pos / np.power(10000, 2 * (j // 2) / d_hid) for j in range(d_hid)]
    tab = np.array([angle_vec(p) for p in range(n_position)], dtype=np.float64)
    tab[:, 0::2] = np.sin(tab[:, 0::2])
    tab[:, 1::2] = np.cos(tab[:, 1::2])
    return jnp.asarray(tab, dtype=jnp.float32)


def init_params(key, d_model, n_head, d_k, d_v, n_layers, n_position):
    inv_temp = 1.0 / (d_k ** 0.5)
    scale = 0.05
    wqkv_l, bqkv_l, wo_l, bo_l = [], [], [], []
    for _ in range(n_layers):
        key, *ks = jax.random.split(key, 9)
        # Fold 1/sqrt(d_k) into the Q projection (weight AND bias): (x@Wq+bq)/temp == x@(Wq/temp)+(bq/temp).
        wq = scale * jax.random.normal(ks[0], (d_model, n_head * d_k), jnp.float32) * inv_temp
        bq = scale * jax.random.normal(ks[1], (n_head * d_k,), jnp.float32) * inv_temp
        wk = scale * jax.random.normal(ks[2], (d_model, n_head * d_k), jnp.float32)
        bk = scale * jax.random.normal(ks[3], (n_head * d_k,), jnp.float32)
        wv = scale * jax.random.normal(ks[4], (d_model, n_head * d_v), jnp.float32)
        bv = scale * jax.random.normal(ks[5], (n_head * d_v,), jnp.float32)
        wo = scale * jax.random.normal(ks[6], (n_head * d_v, d_model), jnp.float32)
        bo = scale * jax.random.normal(ks[7], (d_model,), jnp.float32)
        wqkv_l.append(jnp.concatenate([wq, wk, wv], axis=1))       # (D, H*(2*dk+dv))
        bqkv_l.append(jnp.concatenate([bq, bk, bv])[None, :])      # (1, H*(2*dk+dv))
        wo_l.append(wo)                                            # (H*dv, D)
        bo_l.append(bo[None, :])                                   # (1, D)
    return {
        "pos_table": sinusoid_table(n_position, d_model),
        "ln0_g": jnp.ones((1, d_model), jnp.float32),
        "ln0_b": jnp.zeros((1, d_model), jnp.float32),
        # Per-layer weights stacked on a leading layer axis (loaded once, indexed in-kernel).
        "wqkv": jnp.stack(wqkv_l),                                 # (n_layers, D, 3*H*dk)
        "bqkv": jnp.stack(bqkv_l),                                 # (n_layers, 1, 3*H*dk)
        "wo":   jnp.stack(wo_l),                                   # (n_layers, H*dv, D)
        "bo":   jnp.stack(bo_l),                                   # (n_layers, 1, D)
        "ln_g": jnp.ones((n_layers, 1, d_model), jnp.float32),
        "ln_b": jnp.zeros((n_layers, 1, d_model), jnp.float32),
    }


# ---------------------------------- main ------------------------------------ #

if __name__ == "__main__":
    B, L = 2, 8
    d_model = 32            # d_word_vec == d_model
    n_head, d_q, d_k, d_v = 4, 8, 8, 8
    n_layers = 2
    n_position = 200

    key = jax.random.PRNGKey(0)
    k_x, k_p = jax.random.split(key, 2)

    src_seq = jax.random.normal(k_x, (B, L, d_model), jnp.float32)
    # Additive attention mask (the reference adds the 4-D mask raw to the logits).
    src_mask = jnp.zeros((B, L, L), jnp.float32)

    params = init_params(k_p, d_model, n_head, d_k, d_v, n_layers, n_position)

    out = tonn_encoder(src_seq, src_mask, params,
                       n_head=n_head, d_k=d_k, d_v=d_v, n_layers=n_layers)
    out = jax.block_until_ready(out)

    assert out.shape == (B, L, d_model)
    assert bool(jnp.all(jnp.isfinite(out)))
    print("KERNEL_OK")
</pallas_src>

<mosaic_0001>
module attributes {stable_mosaic.version = 11 : i64} {
  func.func @_encoder_kernel(%arg0: i32, %arg1: memref<1x8x32xf32, #tpu.memory_space<vmem>>, %arg2: memref<1x8x8xf32, #tpu.memory_space<vmem>>, %arg3: memref<8x32xf32, #tpu.memory_space<vmem>>, %arg4: memref<1x32xf32, #tpu.memory_space<vmem>>, %arg5: memref<1x32xf32, #tpu.memory_space<vmem>>, %arg6: memref<2x32x96xf32, #tpu.memory_space<vmem>>, %arg7: memref<2x1x96xf32, #tpu.memory_space<vmem>>, %arg8: memref<2x32x32xf32, #tpu.memory_space<vmem>>, %arg9: memref<2x1x32xf32, #tpu.memory_space<vmem>>, %arg10: memref<2x1x32xf32, #tpu.memory_space<vmem>>, %arg11: memref<2x1x32xf32, #tpu.memory_space<vmem>>, %arg12: memref<1x8x32xf32, #tpu.memory_space<vmem>>) attributes {dimension_semantics = [#tpu.dimension_semantics<parallel>], iteration_bounds = array<i64: 2>, scalar_prefetch = 0 : i64, scratch_operands = 0 : i64, tpu.core_type = #tpu.core_type<tc>, window_params = [{transform_indices = @transform_0, window_bounds = array<i64: 1, 8, 32>}, {transform_indices = @transform_1, window_bounds = array<i64: 1, 8, 8>}, {pipeline_mode = #tpu.pipeline_mode<synchronous>, transform_indices = @transform_2, window_bounds = array<i64: 8, 32>}, {pipeline_mode = #tpu.pipeline_mode<synchronous>, transform_indices = @transform_3, window_bounds = array<i64: 1, 32>}, {pipeline_mode = #tpu.pipeline_mode<synchronous>, transform_indices = @transform_4, window_bounds = array<i64: 1, 32>}, {pipeline_mode = #tpu.pipeline_mode<synchronous>, transform_indices = @transform_5, window_bounds = array<i64: 2, 32, 96>}, {pipeline_mode = #tpu.pipeline_mode<synchronous>, transform_indices = @transform_6, window_bounds = array<i64: 2, 1, 96>}, {pipeline_mode = #tpu.pipeline_mode<synchronous>, transform_indices = @transform_7, window_bounds = array<i64: 2, 32, 32>}, {pipeline_mode = #tpu.pipeline_mode<synchronous>, transform_indices = @transform_8, window_bounds = array<i64: 2, 1, 32>}, {pipeline_mode = #tpu.pipeline_mode<synchronous>, transform_indices = @transform_9, window_bounds = array<i64: 2, 1, 32>}, {pipeline_mode = #tpu.pipeline_mode<synchronous>, transform_indices = @transform_10, window_bounds = array<i64: 2, 1, 32>}, {transform_indices = @transform_11, window_bounds = array<i64: 1, 8, 32>}]} {
    %c0 = arith.constant 0 : index
    %c0_0 = arith.constant 0 : index
    %c0_1 = arith.constant 0 : index
    %0 = vector.load %arg1[%c0, %c0_0, %c0_1] : memref<1x8x32xf32, #tpu.memory_space<vmem>>, vector<1x8x32xf32>
    %1 = vector.shape_cast %0 : vector<1x8x32xf32> to vector<8x32xf32>
    %cst = arith.constant 2.000000e+00 : f32
    %2 = vector.broadcast %cst : f32 to vector<8x32xf32>
    %3 = arith.mulf %2, %1 : vector<8x32xf32>
    %c0_2 = arith.constant 0 : index
    %c0_3 = arith.constant 0 : index
    %4 = vector.load %arg3[%c0_2, %c0_3] : memref<8x32xf32, #tpu.memory_space<vmem>>, vector<8x32xf32>
    %5 = arith.addf %3, %4 : vector<8x32xf32>
    %c0_4 = arith.constant 0 : index
    %c0_5 = arith.constant 0 : index
    %6 = vector.load %arg4[%c0_4, %c0_5] : memref<1x32xf32, #tpu.memory_space<vmem>>, vector<1x32xf32>
    %c0_6 = arith.constant 0 : index
    %c0_7 = arith.constant 0 : index
    %7 = vector.load %arg5[%c0_6, %c0_7] : memref<1x32xf32, #tpu.memory_space<vmem>>, vector<1x32xf32>
    %cst_8 = arith.constant dense<0.000000e+00> : vector<8xf32>
    %8 = vector.multi_reduction <add>, %5, %cst_8 [1] : vector<8x32xf32> to vector<8xf32>
    %9 = vector.shape_cast %8 : vector<8xf32> to vector<8x1xf32>
    %cst_9 = arith.constant 3.200000e+01 : f32
    %10 = vector.broadcast %cst_9 : f32 to vector<8x1xf32>
    %11 = arith.divf %9, %10 : vector<8x1xf32>
    %12 = vector.broadcast %11 : vector<8x1xf32> to vector<8x32xf32>
    %13 = arith.subf %5, %12 : vector<8x32xf32>
    %14 = arith.mulf %13, %13 : vector<8x32xf32>
    %cst_10 = arith.constant dense<0.000000e+00> : vector<8xf32>
    %15 = vector.multi_reduction <add>, %14, %cst_10 [1] : vector<8x32xf32> to vector<8xf32>
    %16 = vector.shape_cast %15 : vector<8xf32> to vector<8x1xf32>
    %cst_11 = arith.constant 3.200000e+01 : f32
    %17 = vector.broadcast %cst_11 : f32 to vector<8x1xf32>
    %18 = arith.divf %16, %17 : vector<8x1xf32>
    %19 = vector.broadcast %11 : vector<8x1xf32> to vector<8x32xf32>
    %20 = arith.subf %5, %19 : vector<8x32xf32>
    %cst_12 = arith.constant 9.99999996E-13 : f32
    %21 = vector.broadcast %cst_12 : f32 to vector<8x1xf32>
    %22 = arith.addf %18, %21 : vector<8x1xf32>
    %23 = math.rsqrt %22 : vector<8x1xf32>
    %24 = vector.broadcast %23 : vector<8x1xf32> to vector<8x32xf32>
    %25 = arith.mulf %20, %24 : vector<8x32xf32>
    %26 = vector.broadcast %6 : vector<1x32xf32> to vector<8x32xf32>
    %27 = arith.mulf %25, %26 : vector<8x32xf32>
    %28 = vector.broadcast %7 : vector<1x32xf32> to vector<8x32xf32>
    %29 = arith.addf %27, %28 : vector<8x32xf32>
    %c0_13 = arith.constant 0 : index
    %c0_14 = arith.constant 0 : index
    %c0_15 = arith.constant 0 : index
    %30 = vector.load %arg2[%c0_13, %c0_14, %c0_15] : memref<1x8x8xf32, #tpu.memory_space<vmem>>, vector<1x8x8xf32>
    %31 = vector.shape_cast %30 : vector<1x8x8xf32> to vector<8x8xf32>
    %32 = vector.shape_cast %31 : vector<8x8xf32> to vector<1x8x8xf32>
    %33 = vector.shape_cast %32 : vector<1x8x8xf32> to vector<1x8x8xf32>
    %34 = vector.broadcast %33 : vector<1x8x8xf32> to vector<4x8x8xf32>
    %c0_16 = arith.constant 0 : index
    %c0_17 = arith.constant 0 : index
    %c0_18 = arith.constant 0 : index
    %35 = vector.load %arg6[%c0_16, %c0_17, %c0_18] : memref<2x32x96xf32, #tpu.memory_space<vmem>>, vector<1x32x96xf32>
    %36 = vector.shape_cast %35 : vector<1x32x96xf32> to vector<32x96xf32>
    %cst_19 = arith.constant dense<0.000000e+00> : vector<8x96xf32>
    %37 = tpu.matmul %29, %36, %cst_19 {dimension_numbers = #tpu.dot_dimension_numbers<[1], [0], [0], [1], [0, 0, 1, 1], [], []>} : vector<8x32xf32>, vector<32x96xf32>, vector<8x96xf32> -> vector<8x96xf32>
    %c0_20 = arith.constant 0 : index
    %c0_21 = arith.constant 0 : index
    %c0_22 = arith.constant 0 : index
    %38 = vector.load %arg7[%c0_20, %c0_21, %c0_22] : memref<2x1x96xf32, #tpu.memory_space<vmem>>, vector<1x1x96xf32>
    %39 = vector.shape_cast %38 : vector<1x1x96xf32> to vector<1x96xf32>
    %40 = vector.broadcast %39 : vector<1x96xf32> to vector<8x96xf32>
    %41 = arith.addf %37, %40 : vector<8x96xf32>
    %42 = vector.extract_strided_slice %41 {offsets = [0, 0], sizes = [8, 32], strides = [1, 1]} : vector<8x96xf32> to vector<8x32xf32>
    %43 = vector.extract_strided_slice %41 {offsets = [0, 32], sizes = [8, 32], strides = [1, 1]} : vector<8x96xf32> to vector<8x32xf32>
    %44 = vector.extract_strided_slice %41 {offsets = [0, 64], sizes = [8, 32], strides = [1, 1]} : vector<8x96xf32> to vector<8x32xf32>
    %45 = vector.extract_strided_slice %42 {offsets = [0, 0], sizes = [8, 8], strides = [1, 1]} : vector<8x32xf32> to vector<8x8xf32>
    %46 = vector.extract_strided_slice %43 {offsets = [0, 0], sizes = [8, 8], strides = [1, 1]} : vector<8x32xf32> to vector<8x8xf32>
    %cst_23 = arith.constant dense<0.000000e+00> : vector<8x8xf32>
    %47 = tpu.matmul %45, %46, %cst_23 {dimension_numbers = #tpu.dot_dimension_numbers<[1], [1], [0], [0], [0, 0, 1, 0], [], []>} : vector<8x8xf32>, vector<8x8xf32>, vector<8x8xf32> -> vector<8x8xf32>
    %48 = vector.extract_strided_slice %42 {offsets = [0, 8], sizes = [8, 8], strides = [1, 1]} : vector<8x32xf32> to vector<8x8xf32>
    %49 = vector.extract_strided_slice %43 {offsets = [0, 8], sizes = [8, 8], strides = [1, 1]} : vector<8x32xf32> to vector<8x8xf32>
    %cst_24 = arith.constant dense<0.000000e+00> : vector<8x8xf32>
    %50 = tpu.matmul %48, %49, %cst_24 {dimension_numbers = #tpu.dot_dimension_numbers<[1], [1], [0], [0], [0, 0, 1, 0], [], []>} : vector<8x8xf32>, vector<8x8xf32>, vector<8x8xf32> -> vector<8x8xf32>
    %51 = vector.extract_strided_slice %42 {offsets = [0, 16], sizes = [8, 8], strides = [1, 1]} : vector<8x32xf32> to vector<8x8xf32>
    %52 = vector.extract_strided_slice %43 {offsets = [0, 16], sizes = [8, 8], strides = [1, 1]} : vector<8x32xf32> to vector<8x8xf32>
    %cst_25 = arith.constant dense<0.000000e+00> : vector<8x8xf32>
    %53 = tpu.matmul %51, %52, %cst_25 {dimension_numbers = #tpu.dot_dimension_numbers<[1], [1], [0], [0], [0, 0, 1, 0], [], []>} : vector<8x8xf32>, vector<8x8xf32>, vector<8x8xf32> -> vector<8x8xf32>
    %54 = vector.extract_strided_slice %42 {offsets = [0, 24], sizes = [8, 8], strides = [1, 1]} : vector<8x32xf32> to vector<8x8xf32>
    %55 = vector.extract_strided_slice %43 {offsets = [0, 24], sizes = [8, 8], strides = [1, 1]} : vector<8x32xf32> to vector<8x8xf32>
    %cst_26 = arith.constant dense<0.000000e+00> : vector<8x8xf32>
    %56 = tpu.matmul %54, %55, %cst_26 {dimension_numbers = #tpu.dot_dimension_numbers<[1], [1], [0], [0], [0, 0, 1, 0], [], []>} : vector<8x8xf32>, vector<8x8xf32>, vector<8x8xf32> -> vector<8x8xf32>
    %57 = vector.shape_cast %47 : vector<8x8xf32> to vector<1x8x8xf32>
    %58 = vector.shape_cast %50 : vector<8x8xf32> to vector<1x8x8xf32>
    %59 = vector.shape_cast %53 : vector<8x8xf32> to vector<1x8x8xf32>
    %60 = vector.shape_cast %56 : vector<8x8xf32> to vector<1x8x8xf32>
    %61 = tpu.concatenate %57, %58, %59, %60 in 0 : vector<1x8x8xf32>, vector<1x8x8xf32>, vector<1x8x8xf32>, vector<1x8x8xf32> -> vector<4x8x8xf32>
    %62 = arith.addf %61, %34 : vector<4x8x8xf32>
    %cst_27 = arith.constant dense<0xFF800000> : vector<4x8xf32>
    %63 = vector.multi_reduction <maximumf>, %62, %cst_27 [2] : vector<4x8x8xf32> to vector<4x8xf32>
    %64 = vector.shape_cast %63 : vector<4x8xf32> to vector<4x8x1xf32>
    %65 = vector.broadcast %64 : vector<4x8x1xf32> to vector<4x8x8xf32>
    %66 = arith.subf %62, %65 : vector<4x8x8xf32>
    %67 = math.exp %66 : vector<4x8x8xf32>
    %cst_28 = arith.constant dense<0.000000e+00> : vector<4x8xf32>
    %68 = vector.multi_reduction <add>, %67, %cst_28 [2] : vector<4x8x8xf32> to vector<4x8xf32>
    %69 = vector.shape_cast %68 : vector<4x8xf32> to vector<4x8x1xf32>
    %70 = vector.broadcast %69 : vector<4x8x1xf32> to vector<4x8x8xf32>
    %71 = arith.divf %67, %70 : vector<4x8x8xf32>
    %72 = vector.extract_strided_slice %71 {offsets = [0, 0, 0], sizes = [1, 8, 8], strides = [1, 1, 1]} : vector<4x8x8xf32> to vector<1x8x8xf32>
    %73 = vector.shape_cast %72 : vector<1x8x8xf32> to vector<8x8xf32>
    %74 = vector.extract_strided_slice %44 {offsets = [0, 0], sizes = [8, 8], strides = [1, 1]} : vector<8x32xf32> to vector<8x8xf32>
    %cst_29 = arith.constant dense<0.000000e+00> : vector<8x8xf32>
    %75 = tpu.matmul %73, %74, %cst_29 {dimension_numbers = #tpu.dot_dimension_numbers<[1], [0], [0], [1], [0, 0, 1, 1], [], []>} : vector<8x8xf32>, vector<8x8xf32>, vector<8x8xf32> -> vector<8x8xf32>
    %76 = vector.extract_strided_slice %71 {offsets = [1, 0, 0], sizes = [1, 8, 8], strides = [1, 1, 1]} : vector<4x8x8xf32> to vector<1x8x8xf32>
    %77 = vector.shape_cast %76 : vector<1x8x8xf32> to vector<8x8xf32>
    %78 = vector.extract_strided_slice %44 {offsets = [0, 8], sizes = [8, 8], strides = [1, 1]} : vector<8x32xf32> to vector<8x8xf32>
    %cst_30 = arith.constant dense<0.000000e+00> : vector<8x8xf32>
    %79 = tpu.matmul %77, %78, %cst_30 {dimension_numbers = #tpu.dot_dimension_numbers<[1], [0], [0], [1], [0, 0, 1, 1], [], []>} : vector<8x8xf32>, vector<8x8xf32>, vector<8x8xf32> -> vector<8x8xf32>
    %80 = vector.extract_strided_slice %71 {offsets = [2, 0, 0], sizes = [1, 8, 8], strides = [1, 1, 1]} : vector<4x8x8xf32> to vector<1x8x8xf32>
    %81 = vector.shape_cast %80 : vector<1x8x8xf32> to vector<8x8xf32>
    %82 = vector.extract_strided_slice %44 {offsets = [0, 16], sizes = [8, 8], strides = [1, 1]} : vector<8x32xf32> to vector<8x8xf32>
    %cst_31 = arith.constant dense<0.000000e+00> : vector<8x8xf32>
    %83 = tpu.matmul %81, %82, %cst_31 {dimension_numbers = #tpu.dot_dimension_numbers<[1], [0], [0], [1], [0, 0, 1, 1], [], []>} : vector<8x8xf32>, vector<8x8xf32>, vector<8x8xf32> -> vector<8x8xf32>
    %84 = vector.extract_strided_slice %71 {offsets = [3, 0, 0], sizes = [1, 8, 8], strides = [1, 1, 1]} : vector<4x8x8xf32> to vector<1x8x8xf32>
    %85 = vector.shape_cast %84 : vector<1x8x8xf32> to vector<8x8xf32>
    %86 = vector.extract_strided_slice %44 {offsets = [0, 24], sizes = [8, 8], strides = [1, 1]} : vector<8x32xf32> to vector<8x8xf32>
    %cst_32 = arith.constant dense<0.000000e+00> : vector<8x8xf32>
    %87 = tpu.matmul %85, %86, %cst_32 {dimension_numbers = #tpu.dot_dimension_numbers<[1], [0], [0], [1], [0, 0, 1, 1], [], []>} : vector<8x8xf32>, vector<8x8xf32>, vector<8x8xf32> -> vector<8x8xf32>
    %88 = tpu.concatenate %75, %79, %83, %87 in 1 : vector<8x8xf32>, vector<8x8xf32>, vector<8x8xf32>, vector<8x8xf32> -> vector<8x32xf32>
    %c0_33 = arith.constant 0 : index
    %c0_34 = arith.constant 0 : index
    %c0_35 = arith.constant 0 : index
    %89 = vector.load %arg8[%c0_33, %c0_34, %c0_35] : memref<2x32x32xf32, #tpu.memory_space<vmem>>, vector<1x32x32xf32>
    %90 = vector.shape_cast %89 : vector<1x32x32xf32> to vector<32x32xf32>
    %cst_36 = arith.constant dense<0.000000e+00> : vector<8x32xf32>
    %91 = tpu.matmul %88, %90, %cst_36 {dimension_numbers = #tpu.dot_dimension_numbers<[1], [0], [0], [1], [0, 0, 1, 1], [], []>} : vector<8x32xf32>, vector<32x32xf32>, vector<8x32xf32> -> vector<8x32xf32>
    %c0_37 = arith.constant 0 : index
    %c0_38 = arith.constant 0 : index
    %c0_39 = arith.constant 0 : index
    %92 = vector.load %arg9[%c0_37, %c0_38, %c0_39] : memref<2x1x32xf32, #tpu.memory_space<vmem>>, vector<1x1x32xf32>
    %93 = vector.shape_cast %92 : vector<1x1x32xf32> to vector<1x32xf32>
    %94 = vector.broadcast %93 : vector<1x32xf32> to vector<8x32xf32>
    %95 = arith.addf %91, %94 : vector<8x32xf32>
    %96 = arith.addf %95, %29 : vector<8x32xf32>
    %c0_40 = arith.constant 0 : index
    %c0_41 = arith.constant 0 : index
    %c0_42 = arith.constant 0 : index
    %97 = vector.load %arg10[%c0_40, %c0_41, %c0_42] : memref<2x1x32xf32, #tpu.memory_space<vmem>>, vector<1x1x32xf32>
    %98 = vector.shape_cast %97 : vector<1x1x32xf32> to vector<1x32xf32>
    %c0_43 = arith.constant 0 : index
    %c0_44 = arith.constant 0 : index
    %c0_45 = arith.constant 0 : index
    %99 = vector.load %arg11[%c0_43, %c0_44, %c0_45] : memref<2x1x32xf32, #tpu.memory_space<vmem>>, vector<1x1x32xf32>
    %100 = vector.shape_cast %99 : vector<1x1x32xf32> to vector<1x32xf32>
    %cst_46 = arith.constant dense<0.000000e+00> : vector<8xf32>
    %101 = vector.multi_reduction <add>, %96, %cst_46 [1] : vector<8x32xf32> to vector<8xf32>
    %102 = vector.shape_cast %101 : vector<8xf32> to vector<8x1xf32>
    %cst_47 = arith.constant 3.200000e+01 : f32
    %103 = vector.broadcast %cst_47 : f32 to vector<8x1xf32>
    %104 = arith.divf %102, %103 : vector<8x1xf32>
    %105 = vector.broadcast %104 : vector<8x1xf32> to vector<8x32xf32>
    %106 = arith.subf %96, %105 : vector<8x32xf32>
    %107 = arith.mulf %106, %106 : vector<8x32xf32>
    %cst_48 = arith.constant dense<0.000000e+00> : vector<8xf32>
    %108 = vector.multi_reduction <add>, %107, %cst_48 [1] : vector<8x32xf32> to vector<8xf32>
    %109 = vector.shape_cast %108 : vector<8xf32> to vector<8x1xf32>
    %cst_49 = arith.constant 3.200000e+01 : f32
    %110 = vector.broadcast %cst_49 : f32 to vector<8x1xf32>
    %111 = arith.divf %109, %110 : vector<8x1xf32>
    %112 = vector.broadcast %104 : vector<8x1xf32> to vector<8x32xf32>
    %113 = arith.subf %96, %112 : vector<8x32xf32>
    %cst_50 = arith.constant 9.99999996E-13 : f32
    %114 = vector.broadcast %cst_50 : f32 to vector<8x1xf32>
    %115 = arith.addf %111, %114 : vector<8x1xf32>
    %116 = math.rsqrt %115 : vector<8x1xf32>
    %117 = vector.broadcast %116 : vector<8x1xf32> to vector<8x32xf32>
    %118 = arith.mulf %113, %117 : vector<8x32xf32>
    %119 = vector.broadcast %98 : vector<1x32xf32> to vector<8x32xf32>
    %120 = arith.mulf %118, %119 : vector<8x32xf32>
    %121 = vector.broadcast %100 : vector<1x32xf32> to vector<8x32xf32>
    %122 = arith.addf %120, %121 : vector<8x32xf32>
    %c1 = arith.constant 1 : index
    %c0_51 = arith.constant 0 : index
    %c0_52 = arith.constant 0 : index
    %123 = vector.load %arg6[%c1, %c0_51, %c0_52] : memref<2x32x96xf32, #tpu.memory_space<vmem>>, vector<1x32x96xf32>
    %124 = vector.shape_cast %123 : vector<1x32x96xf32> to vector<32x96xf32>
    %cst_53 = arith.constant dense<0.000000e+00> : vector<8x96xf32>
    %125 = tpu.matmul %122, %124, %cst_53 {dimension_numbers = #tpu.dot_dimension_numbers<[1], [0], [0], [1], [0, 0, 1, 1], [], []>} : vector<8x32xf32>, vector<32x96xf32>, vector<8x96xf32> -> vector<8x96xf32>
    %c1_54 = arith.constant 1 : index
    %c0_55 = arith.constant 0 : index
    %c0_56 = arith.constant 0 : index
    %126 = vector.load %arg7[%c1_54, %c0_55, %c0_56] : memref<2x1x96xf32, #tpu.memory_space<vmem>>, vector<1x1x96xf32>
    %127 = vector.shape_cast %126 : vector<1x1x96xf32> to vector<1x96xf32>
    %128 = vector.broadcast %127 : vector<1x96xf32> to vector<8x96xf32>
    %129 = arith.addf %125, %128 : vector<8x96xf32>
    %130 = vector.extract_strided_slice %129 {offsets = [0, 0], sizes = [8, 32], strides = [1, 1]} : vector<8x96xf32> to vector<8x32xf32>
    %131 = vector.extract_strided_slice %129 {offsets = [0, 32], sizes = [8, 32], strides = [1, 1]} : vector<8x96xf32> to vector<8x32xf32>
    %132 = vector.extract_strided_slice %129 {offsets = [0, 64], sizes = [8, 32], strides = [1, 1]} : vector<8x96xf32> to vector<8x32xf32>
    %133 = vector.extract_strided_slice %130 {offsets = [0, 0], sizes = [8, 8], strides = [1, 1]} : vector<8x32xf32> to vector<8x8xf32>
    %134 = vector.extract_strided_slice %131 {offsets = [0, 0], sizes = [8, 8], strides = [1, 1]} : vector<8x32xf32> to vector<8x8xf32>
    %cst_57 = arith.constant dense<0.000000e+00> : vector<8x8xf32>
    %135 = tpu.matmul %133, %134, %cst_57 {dimension_numbers = #tpu.dot_dimension_numbers<[1], [1], [0], [0], [0, 0, 1, 0], [], []>} : vector<8x8xf32>, vector<8x8xf32>, vector<8x8xf32> -> vector<8x8xf32>
    %136 = vector.extract_strided_slice %130 {offsets = [0, 8], sizes = [8, 8], strides = [1, 1]} : vector<8x32xf32> to vector<8x8xf32>
    %137 = vector.extract_strided_slice %131 {offsets = [0, 8], sizes = [8, 8], strides = [1, 1]} : vector<8x32xf32> to vector<8x8xf32>
    %cst_58 = arith.constant dense<0.000000e+00> : vector<8x8xf32>
    %138 = tpu.matmul %136, %137, %cst_58 {dimension_numbers = #tpu.dot_dimension_numbers<[1], [1], [0], [0], [0, 0, 1, 0], [], []>} : vector<8x8xf32>, vector<8x8xf32>, vector<8x8xf32> -> vector<8x8xf32>
    %139 = vector.extract_strided_slice %130 {offsets = [0, 16], sizes = [8, 8], strides = [1, 1]} : vector<8x32xf32> to vector<8x8xf32>
    %140 = vector.extract_strided_slice %131 {offsets = [0, 16], sizes = [8, 8], strides = [1, 1]} : vector<8x32xf32> to vector<8x8xf32>
    %cst_59 = arith.constant dense<0.000000e+00> : vector<8x8xf32>
    %141 = tpu.matmul %139, %140, %cst_59 {dimension_numbers = #tpu.dot_dimension_numbers<[1], [1], [0], [0], [0, 0, 1, 0], [], []>} : vector<8x8xf32>, vector<8x8xf32>, vector<8x8xf32> -> vector<8x8xf32>
    %142 = vector.extract_strided_slice %130 {offsets = [0, 24], sizes = [8, 8], strides = [1, 1]} : vector<8x32xf32> to vector<8x8xf32>
    %143 = vector.extract_strided_slice %131 {offsets = [0, 24], sizes = [8, 8], strides = [1, 1]} : vector<8x32xf32> to vector<8x8xf32>
    %cst_60 = arith.constant dense<0.000000e+00> : vector<8x8xf32>
    %144 = tpu.matmul %142, %143, %cst_60 {dimension_numbers = #tpu.dot_dimension_numbers<[1], [1], [0], [0], [0, 0, 1, 0], [], []>} : vector<8x8xf32>, vector<8x8xf32>, vector<8x8xf32> -> vector<8x8xf32>
    %145 = vector.shape_cast %135 : vector<8x8xf32> to vector<1x8x8xf32>
    %146 = vector.shape_cast %138 : vector<8x8xf32> to vector<1x8x8xf32>
    %147 = vector.shape_cast %141 : vector<8x8xf32> to vector<1x8x8xf32>
    %148 = vector.shape_cast %144 : vector<8x8xf32> to vector<1x8x8xf32>
    %149 = tpu.concatenate %145, %146, %147, %148 in 0 : vector<1x8x8xf32>, vector<1x8x8xf32>, vector<1x8x8xf32>, vector<1x8x8xf32> -> vector<4x8x8xf32>
    %150 = arith.addf %149, %34 : vector<4x8x8xf32>
    %cst_61 = arith.constant dense<0xFF800000> : vector<4x8xf32>
    %151 = vector.multi_reduction <maximumf>, %150, %cst_61 [2] : vector<4x8x8xf32> to vector<4x8xf32>
    %152 = vector.shape_cast %151 : vector<4x8xf32> to vector<4x8x1xf32>
    %153 = vector.broadcast %152 : vector<4x8x1xf32> to vector<4x8x8xf32>
    %154 = arith.subf %150, %153 : vector<4x8x8xf32>
    %155 = math.exp %154 : vector<4x8x8xf32>
    %cst_62 = arith.constant dense<0.000000e+00> : vector<4x8xf32>
    %156 = vector.multi_reduction <add>, %155, %cst_62 [2] : vector<4x8x8xf32> to vector<4x8xf32>
    %157 = vector.shape_cast %156 : vector<4x8xf32> to vector<4x8x1xf32>
    %158 = vector.broadcast %157 : vector<4x8x1xf32> to vector<4x8x8xf32>
    %159 = arith.divf %155, %158 : vector<4x8x8xf32>
    %160 = vector.extract_strided_slice %159 {offsets = [0, 0, 0], sizes = [1, 8, 8], strides = [1, 1, 1]} : vector<4x8x8xf32> to vector<1x8x8xf32>
    %161 = vector.shape_cast %160 : vector<1x8x8xf32> to vector<8x8xf32>
    %162 = vector.extract_strided_slice %132 {offsets = [0, 0], sizes = [8, 8], strides = [1, 1]} : vector<8x32xf32> to vector<8x8xf32>
    %cst_63 = arith.constant dense<0.000000e+00> : vector<8x8xf32>
    %163 = tpu.matmul %161, %162, %cst_63 {dimension_numbers = #tpu.dot_dimension_numbers<[1], [0], [0], [1], [0, 0, 1, 1], [], []>} : vector<8x8xf32>, vector<8x8xf32>, vector<8x8xf32> -> vector<8x8xf32>
    %164 = vector.extract_strided_slice %159 {offsets = [1, 0, 0], sizes = [1, 8, 8], strides = [1, 1, 1]} : vector<4x8x8xf32> to vector<1x8x8xf32>
    %165 = vector.shape_cast %164 : vector<1x8x8xf32> to vector<8x8xf32>
    %166 = vector.extract_strided_slice %132 {offsets = [0, 8], sizes = [8, 8], strides = [1, 1]} : vector<8x32xf32> to vector<8x8xf32>
    %cst_64 = arith.constant dense<0.000000e+00> : vector<8x8xf32>
    %167 = tpu.matmul %165, %166, %cst_64 {dimension_numbers = #tpu.dot_dimension_numbers<[1], [0], [0], [1], [0, 0, 1, 1], [], []>} : vector<8x8xf32>, vector<8x8xf32>, vector<8x8xf32> -> vector<8x8xf32>
    %168 = vector.extract_strided_slice %159 {offsets = [2, 0, 0], sizes = [1, 8, 8], strides = [1, 1, 1]} : vector<4x8x8xf32> to vector<1x8x8xf32>
    %169 = vector.shape_cast %168 : vector<1x8x8xf32> to vector<8x8xf32>
    %170 = vector.extract_strided_slice %132 {offsets = [0, 16], sizes = [8, 8], strides = [1, 1]} : vector<8x32xf32> to vector<8x8xf32>
    %cst_65 = arith.constant dense<0.000000e+00> : vector<8x8xf32>
    %171 = tpu.matmul %169, %170, %cst_65 {dimension_numbers = #tpu.dot_dimension_numbers<[1], [0], [0], [1], [0, 0, 1, 1], [], []>} : vector<8x8xf32>, vector<8x8xf32>, vector<8x8xf32> -> vector<8x8xf32>
    %172 = vector.extract_strided_slice %159 {offsets = [3, 0, 0], sizes = [1, 8, 8], strides = [1, 1, 1]} : vector<4x8x8xf32> to vector<1x8x8xf32>
    %173 = vector.shape_cast %172 : vector<1x8x8xf32> to vector<8x8xf32>
    %174 = vector.extract_strided_slice %132 {offsets = [0, 24], sizes = [8, 8], strides = [1, 1]} : vector<8x32xf32> to vector<8x8xf32>
    %cst_66 = arith.constant dense<0.000000e+00> : vector<8x8xf32>
    %175 = tpu.matmul %173, %174, %cst_66 {dimension_numbers = #tpu.dot_dimension_numbers<[1], [0], [0], [1], [0, 0, 1, 1], [], []>} : vector<8x8xf32>, vector<8x8xf32>, vector<8x8xf32> -> vector<8x8xf32>
    %176 = tpu.concatenate %163, %167, %171, %175 in 1 : vector<8x8xf32>, vector<8x8xf32>, vector<8x8xf32>, vector<8x8xf32> -> vector<8x32xf32>
    %c1_67 = arith.constant 1 : index
    %c0_68 = arith.constant 0 : index
    %c0_69 = arith.constant 0 : index
    %177 = vector.load %arg8[%c1_67, %c0_68, %c0_69] : memref<2x32x32xf32, #tpu.memory_space<vmem>>, vector<1x32x32xf32>
    %178 = vector.shape_cast %177 : vector<1x32x32xf32> to vector<32x32xf32>
    %cst_70 = arith.constant dense<0.000000e+00> : vector<8x32xf32>
    %179 = tpu.matmul %176, %178, %cst_70 {dimension_numbers = #tpu.dot_dimension_numbers<[1], [0], [0], [1], [0, 0, 1, 1], [], []>} : vector<8x32xf32>, vector<32x32xf32>, vector<8x32xf32> -> vector<8x32xf32>
    %c1_71 = arith.constant 1 : index
    %c0_72 = arith.constant 0 : index
    %c0_73 = arith.constant 0 : index
    %180 = vector.load %arg9[%c1_71, %c0_72, %c0_73] : memref<2x1x32xf32, #tpu.memory_space<vmem>>, vector<1x1x32xf32>
    %181 = vector.shape_cast %180 : vector<1x1x32xf32> to vector<1x32xf32>
    %182 = vector.broadcast %181 : vector<1x32xf32> to vector<8x32xf32>
    %183 = arith.addf %179, %182 : vector<8x32xf32>
    %184 = arith.addf %183, %122 : vector<8x32xf32>
    %c1_74 = arith.constant 1 : index
    %c0_75 = arith.constant 0 : index
    %c0_76 = arith.constant 0 : index
    %185 = vector.load %arg10[%c1_74, %c0_75, %c0_76] : memref<2x1x32xf32, #tpu.memory_space<vmem>>, vector<1x1x32xf32>
    %186 = vector.shape_cast %185 : vector<1x1x32xf32> to vector<1x32xf32>
    %c1_77 = arith.constant 1 : index
    %c0_78 = arith.constant 0 : index
    %c0_79 = arith.constant 0 : index
    %187 = vector.load %arg11[%c1_77, %c0_78, %c0_79] : memref<2x1x32xf32, #tpu.memory_space<vmem>>, vector<1x1x32xf32>
    %188 = vector.shape_cast %187 : vector<1x1x32xf32> to vector<1x32xf32>
    %cst_80 = arith.constant dense<0.000000e+00> : vector<8xf32>
    %189 = vector.multi_reduction <add>, %184, %cst_80 [1] : vector<8x32xf32> to vector<8xf32>
    %190 = vector.shape_cast %189 : vector<8xf32> to vector<8x1xf32>
    %cst_81 = arith.constant 3.200000e+01 : f32
    %191 = vector.broadcast %cst_81 : f32 to vector<8x1xf32>
    %192 = arith.divf %190, %191 : vector<8x1xf32>
    %193 = vector.broadcast %192 : vector<8x1xf32> to vector<8x32xf32>
    %194 = arith.subf %184, %193 : vector<8x32xf32>
    %195 = arith.mulf %194, %194 : vector<8x32xf32>
    %cst_82 = arith.constant dense<0.000000e+00> : vector<8xf32>
    %196 = vector.multi_reduction <add>, %195, %cst_82 [1] : vector<8x32xf32> to vector<8xf32>
    %197 = vector.shape_cast %196 : vector<8xf32> to vector<8x1xf32>
    %cst_83 = arith.constant 3.200000e+01 : f32
    %198 = vector.broadcast %cst_83 : f32 to vector<8x1xf32>
    %199 = arith.divf %197, %198 : vector<8x1xf32>
    %200 = vector.broadcast %192 : vector<8x1xf32> to vector<8x32xf32>
    %201 = arith.subf %184, %200 : vector<8x32xf32>
    %cst_84 = arith.constant 9.99999996E-13 : f32
    %202 = vector.broadcast %cst_84 : f32 to vector<8x1xf32>
    %203 = arith.addf %199, %202 : vector<8x1xf32>
    %204 = math.rsqrt %203 : vector<8x1xf32>
    %205 = vector.broadcast %204 : vector<8x1xf32> to vector<8x32xf32>
    %206 = arith.mulf %201, %205 : vector<8x32xf32>
    %207 = vector.broadcast %186 : vector<1x32xf32> to vector<8x32xf32>
    %208 = arith.mulf %206, %207 : vector<8x32xf32>
    %209 = vector.broadcast %188 : vector<1x32xf32> to vector<8x32xf32>
    %210 = arith.addf %208, %209 : vector<8x32xf32>
    %c0_85 = arith.constant 0 : index
    %c0_86 = arith.constant 0 : index
    %c0_87 = arith.constant 0 : index
    %211 = vector.load %arg12[%c0_85, %c0_86, %c0_87] : memref<1x8x32xf32, #tpu.memory_space<vmem>>, vector<1x8x32xf32>
    %212 = vector.shape_cast %211 : vector<1x8x32xf32> to vector<8x32xf32>
    %213 = vector.shape_cast %210 : vector<8x32xf32> to vector<1x8x32xf32>
    tpu.vector_store %arg12[%c0_85, %c0_86, %c0_87], %213 {strides = array<i32>} : memref<1x8x32xf32, #tpu.memory_space<vmem>>, vector<1x8x32xf32>,
    return
  }
  func.func @transform_0(%arg0: i32) -> (i32, i32, i32) {
    %c0_i32 = arith.constant 0 : i32
    %c0_i32_0 = arith.constant 0 : i32
    %c0_i32_1 = arith.constant 0 : i32
    return %arg0, %c0_i32, %c0_i32_0 : i32, i32, i32
  }
  func.func @transform_1(%arg0: i32) -> (i32, i32, i32) {
    %c0_i32 = arith.constant 0 : i32
    %c0_i32_0 = arith.constant 0 : i32
    %c0_i32_1 = arith.constant 0 : i32
    return %arg0, %c0_i32, %c0_i32_0 : i32, i32, i32
  }
  func.func @transform_2(%arg0: i32) -> (i32, i32) {
    %c0_i32 = arith.constant 0 : i32
    %c0_i32_0 = arith.constant 0 : i32
    %c0_i32_1 = arith.constant 0 : i32
    return %c0_i32, %c0_i32_0 : i32, i32
  }
  func.func @transform_3(%arg0: i32) -> (i32, i32) {
    %c0_i32 = arith.constant 0 : i32
    %c0_i32_0 = arith.constant 0 : i32
    %c0_i32_1 = arith.constant 0 : i32
    return %c0_i32, %c0_i32_0 : i32, i32
  }
  func.func @transform_4(%arg0: i32) -> (i32, i32) {
    %c0_i32 = arith.constant 0 : i32
    %c0_i32_0 = arith.constant 0 : i32
    %c0_i32_1 = arith.constant 0 : i32
    return %c0_i32, %c0_i32_0 : i32, i32
  }
  func.func @transform_5(%arg0: i32) -> (i32, i32, i32) {
    %c0_i32 = arith.constant 0 : i32
    %c0_i32_0 = arith.constant 0 : i32
    %c0_i32_1 = arith.constant 0 : i32
    %c0_i32_2 = arith.constant 0 : i32
    return %c0_i32, %c0_i32_0, %c0_i32_1 : i32, i32, i32
  }
  func.func @transform_6(%arg0: i32) -> (i32, i32, i32) {
    %c0_i32 = arith.constant 0 : i32
    %c0_i32_0 = arith.constant 0 : i32
    %c0_i32_1 = arith.constant 0 : i32
    %c0_i32_2 = arith.constant 0 : i32
    return %c0_i32, %c0_i32_0, %c0_i32_1 : i32, i32, i32
  }
  func.func @transform_7(%arg0: i32) -> (i32, i32, i32) {
    %c0_i32 = arith.constant 0 : i32
    %c0_i32_0 = arith.constant 0 : i32
    %c0_i32_1 = arith.constant 0 : i32
    %c0_i32_2 = arith.constant 0 : i32
    return %c0_i32, %c0_i32_0, %c0_i32_1 : i32, i32, i32
  }
  func.func @transform_8(%arg0: i32) -> (i32, i32, i32) {
    %c0_i32 = arith.constant 0 : i32
    %c0_i32_0 = arith.constant 0 : i32
    %c0_i32_1 = arith.constant 0 : i32
    %c0_i32_2 = arith.constant 0 : i32
    return %c0_i32, %c0_i32_0, %c0_i32_1 : i32, i32, i32
  }
  func.func @transform_9(%arg0: i32) -> (i32, i32, i32) {
    %c0_i32 = arith.constant 0 : i32
    %c0_i32_0 = arith.constant 0 : i32
    %c0_i32_1 = arith.constant 0 : i32
    %c0_i32_2 = arith.constant 0 : i32
    return %c0_i32, %c0_i32_0, %c0_i32_1 : i32, i32, i32
  }
  func.func @transform_10(%arg0: i32) -> (i32, i32, i32) {
    %c0_i32 = arith.constant 0 : i32
    %c0_i32_0 = arith.constant 0 : i32
    %c0_i32_1 = arith.constant 0 : i32
    %c0_i32_2 = arith.constant 0 : i32
    return %c0_i32, %c0_i32_0, %c0_i32_1 : i32, i32, i32
  }
  func.func @transform_11(%arg0: i32) -> (i32, i32, i32) {
    %c0_i32 = arith.constant 0 : i32
    %c0_i32_0 = arith.constant 0 : i32
    %c0_i32_1 = arith.constant 0 : i32
    return %arg0, %c0_i32, %c0_i32_0 : i32, i32, i32
  }
}

</mosaic_0001>

<bundles_post_ra>
// kernel: tpu_custom_call.1
= control target key start
LH: loop header
LB: loop body
LE: loop exit
PB: predicated region body
PF: predicated region fallthrough
CT: control target
= control target key end

     0   :  { %s3636_s0 = inlined_call_operand.hbm [shape: f32[2,8,32], index: 0, kind: input, shape index: {}]   ;;  %s3637_s1 = inlined_call_operand.hbm [shape: f32[2,8,8], index: 1, kind: input, shape index: {}]   ;;  %s3638_s2 = inlined_call_operand.hbm [shape: f32[8,32], index: 2, kind: input, shape index: {}]   ;;  %s3639_s3 = inlined_call_operand.vmem [shape: f32[1,32], index: 3, kind: input, shape index: {}]   ;;  %s3640_s4 = inlined_call_operand.hbm [shape: f32[1,32], index: 4, kind: input, shape index: {}]   ;;  %s3641_s5 = inlined_call_operand.hbm [shape: f32[2,32,96], index: 5, kind: input, shape index: {}]   ;;  %s3642_s6 = inlined_call_operand.vmem [shape: f32[2,1,96], index: 6, kind: input, shape index: {}]   ;;  %s3643_s7 = inlined_call_operand.hbm [shape: f32[2,32,32], index: 7, kind: input, shape index: {}]   ;;  %s3644_s8 = inlined_call_operand.vmem [shape: f32[2,1,32], index: 8, kind: input, shape index: {}]   ;;  %s3645_s9 = inlined_call_operand.vmem [shape: f32[2,1,32], index: 9, kind: input, shape index: {}]   ;;  %s3646_s10 = inlined_call_operand.vmem [shape: f32[2,1,32], index: 10, kind: input, shape index: {}]   ;;  %s3647_s11 = inlined_call_operand.hbm [shape: f32[2,8,32], index: 11, kind: output, shape index: {}]  }
   0x1   :  { %3660 = sst [smem:[#allocation24_spill]] %s3638_s2 }
   0x2   :  { %3661 = sst [smem:[#allocation25_spill]] %s3640_s4 }
   0x3   :  { %3662 = sst [smem:[#allocation26_spill]] %s3641_s5 }
   0x4   :  { %3663 = sst [smem:[#allocation27_spill]] %s3643_s7 }
   0x5   :  { %16 = vsyncpa [#allocation3], 0 }
   0x6   :  { %18 = vsyncpa [#allocation3 + $0x1], 0 }
   0x7   :  { %19 = vsyncpa [#allocation6], 0 }
   0x8   :  { %21 = vsyncpa [#allocation6 + $0x1], 0 }
   0x9   :  { %22 = vsyncpa [#allocation9], 0 }
   0xa   :  { %23 = vsyncpa [#allocation12], 0 }
   0xb   :  { %24 = vsyncpa [#allocation4], 0 }
   0xc   :  { %26 = vsyncpa [#allocation4 + $0x1], 0  ;;  %s3152_s17 = smov 0   ;;  %s3154_s18 = smov 0  }
   0xd   :  { %s3156_s19 = smov 0   ;;  %s3158_s20 = smov 0  }
   0xe LB: > { %3664 = sst [smem:[#allocation20_spill]] %s3061_s19  ;;  %s3067_s21 = smov [#allocation7]   ;;  %s3065_s20 = sphi %s3158_s20, %s3696_s20   ;;  %s3061_s19 = sphi %s3156_s19, %s3698_s19   ;;  %s3057_s18 = sphi %s3154_s18, %s3700_s18   ;;  %s3053_s17 = sphi %s3152_s17, %s3699_s17  }
   0xf   : > { %s317_s22 = sshll.u32 %s3067_s21, 4  ;;  %s3173_s23 = sadd.s32 4294967295, %s3065_s20   ;;  %s318_s22 = int_to_ptr.vmem [resolvable:$true] %s317_s22 }
  0x10   : > { %p2437_p0 = scmp.ge.s32.totalorder %s3065_s20, 1  ;;  %p3648_p1 = scmp.eq.s32.totalorder %s3173_s23, 0 }
  0x11   : > { %p304_p2 = scmp.lt.s32.totalorder %s3065_s20, 3  ;;  %s3068_s25 = smov [#allocation8]  }
  0x12   : > { %s331_s26 = sshll.u32 %s3068_s25, 4  ;;  %s3069_s27 = smov [#allocation10]   ;;  %s332_s26 = int_to_ptr.vmem [resolvable:$true] %s331_s26 }
  0x13   : > { %p3178_p3 = pnand %p2437_p0, %p304_p2  ;;  %s341_s28 = sshll.u32 %s3069_s27, 4  ;;  %s3191_s28 = int_to_ptr.vmem [resolvable:$true] %s341_s28 }
  0x14   : > { %s2836_s30 = scalar_lea.vmem %s318_s22, 128  ;;  %p2844_p11 = scmp.lt.s32.totalorder %s318_s22, %s318_s22 }
  0x15   : > { %s3665_s24 = scalar_select %p3178_p3, 1, 0 }
  0x16   : > { %p2699_p5 = pneg %p3178_p3  ;;  %p2837_p8 = scmp.ne.s32.totalorder %s318_s22, %s2836_s30 }
  0x17   : > { %p2845_p12 = scmp.lt.s32.totalorder %s2836_s30, %s2836_s30 }
  0x18   : > { %p3187_p6 = pnand %p2699_p5, %p3648_p1 }
  0x19   : > { %p2846_p13 = por %p2845_p12, %p2844_p11 }
  0x1a   : > { %p2827_p7 = pneg %p3187_p6 }
  0x1c   : > { %p2839_p9 = pnand %p2837_p8, %p2827_p7 }
  0x1e   : > { %p2840_p10 = pneg %p2839_p9 }
  0x20   : > { %p2847_p0 = pnand %p2846_p13, %p2840_p10 }
  0x22   : > { %2850 = shalt.err (!%p2847_p0)
}
  0x23   : > { %s3667_s2 = sld [smem:[#allocation24_spill]]  ;;  %s2862_s14 = scalar_lea.vmem %s332_s26, 16 }
  0x24   : > { %p2863_p2 = scmp.ne.s32.totalorder %s332_s26, %s2862_s14  ;;  %s2869_s15 = scalar_lea.vmem %s332_s26, 32 }
  0x25   : > { %p2870_p8 = scmp.lt.s32.totalorder %s332_s26, %s332_s26  ;;  %p2871_p9 = scmp.lt.s32.totalorder %s2869_s15, %s2862_s14 }
  0x26   : > { %p2865_p5 = pnand %p2863_p2, %p2827_p7 }
  0x27   : > { %p2872_p1 = por %p2871_p9, %p2870_p8 }
  0x28   : > { %p2866_p4 = pneg %p2865_p5 }
  0x29   : > { %2702 = dma.hbm_to_vmem [thread:$0]  (!%p3187_p6), %s3667_s2, 128, %s318_s22, [#allocation6]  }
  0x2a   : > { %p2873_p11 = pnand %p2872_p1, %p2866_p4 }
  0x2c   : > { %2876 = shalt.err (!%p2873_p11)
}
  0x2d   : > { %s3668_s4 = sld [smem:[#allocation25_spill]]  ;;  %s2888_s22 = scalar_lea.vmem %s3191_s28, 1024 }
  0x2e   : > { %p2889_p10 = scmp.ne.s32.totalorder %s3191_s28, %s2888_s22  ;;  %p2896_p0 = scmp.lt.s32.totalorder %s3191_s28, %s3191_s28 }
  0x2f   : > { %p2897_p1 = scmp.lt.s32.totalorder %s2888_s22, %s2888_s22 }
  0x30   : > { %p2891_p12 = pnand %p2889_p10, %p2827_p7 }
  0x31   : > { %p2898_p4 = por %p2897_p1, %p2896_p0 }
  0x32   : > { %p2892_p13 = pneg %p2891_p12 }
  0x33   : > { %2705 = dma.hbm_to_vmem [thread:$0]  (!%p3187_p6), %s3668_s4, 16, %s332_s26, [#allocation9]  }
  0x34   : > { %p2899_p2 = pnand %p2898_p4, %p2892_p13 }
  0x36   : > { %2902 = shalt.err (!%p2899_p2)
}
  0x37   : > { %s3070_s25 = smov 128   ;;  %s3071_s27 = smov 8  }
  0x38   : > { %s3669_s5 = sld [smem:[#allocation26_spill]]  ;;  %s3072_s12 = smov [#allocation11]  }
  0x39   : > { %s357_s13 = sshll.u32 %s3072_s12, 4  ;;  %s358_s13 = int_to_ptr.vmem [resolvable:$true] %s357_s13 }
  0x3a   : > { %s2914_s14 = scalar_lea.vmem %s358_s13, 1024  ;;  %p2922_p11 = scmp.lt.s32.totalorder %s358_s13, %s358_s13 }
  0x3b   : > { %p2915_p5 = scmp.ne.s32.totalorder %s358_s13, %s2914_s14  ;;  %p2923_p10 = scmp.lt.s32.totalorder %s2914_s14, %s2914_s14 }
  0x3d   : > { %p2917_p8 = pnand %p2915_p5, %p2827_p7  ;;  %p2924_p12 = por %p2923_p10, %p2922_p11 }
  0x3e   : > { %2708 = dma.hbm_to_vmem [thread:$0]  (!%p3187_p6), %s3669_s5, 1024, %s3191_s28, [#allocation9], %s3070_s25, %s3070_s25, %s3071_s27  }
  0x3f   : > { %p2918_p9 = pneg %p2917_p8 }
  0x41   : > { %p2925_p13 = pnand %p2924_p12, %p2918_p9 }
  0x43   : > { %2928 = shalt.err (!%p2925_p13)
}
  0x44   : > { %s3670_s7 = sld [smem:[#allocation27_spill]]  ;;  %s2436_s28 = sadd.s32 4294967294, %s3065_s20  }
  0x45   : > { %s3234_s29 = sadd.s32 1, %s3065_s20   ;;  %s39_s22 = sadd.s32 1, %s3061_s19 }
  0x46   : > { %3671 = sst [smem:[#allocation21_spill]] %s3234_s29  ;;  %s36_s21 = ssub.s32 %s3065_s20, %s3234_s29 }
  0x47   : > { %p37_p7 = scmp.eq.s32.totalorder %s36_s21, 0  ;;  %p46_p0 = scmp.ne.s32.totalorder %s3061_s19, %s3057_s18 }
  0x48   : > { %p47_p1 = scmp.eq.s32.totalorder %s3065_s20, 0  ;;  %p52_p4 = scmp.ne.s32.totalorder %s3057_s18, %s3053_s17 }
  0x49   : > { %s3245_s30 = scalar_select %p37_p7, %s3061_s19, %s39_s22  }
  0x4a   : > { %2711 = dma.hbm_to_vmem [thread:$0]  (!%p3187_p6), %s3670_s7, 1024, %s358_s13, [#allocation12], %s3070_s25, %s3070_s25, %s3071_s27  }
  0x4b   : > { %3672 = sst [smem:[#allocation22_spill]] %s3245_s30  ;;  %p3247_p2 = por %p47_p1, %p46_p0 }
  0x4c   : > { %p3674_p5 = scmp.eq.s32.totalorder %s3173_s23, 0  ;;  %p291_p8 = scmp.eq.s32.totalorder %s3173_s23, 1 }
  0x4d   : > { %p297_p9 = scmp.eq.s32.totalorder %s2436_s28, 1  ;;  %p2727_p11 = scmp.lt.s32.totalorder %s3065_s20, 2 }
  0x4e   : > { %p3253_p6 = por %p3674_p5, %p52_p4  ;;  %s380_s27 = sand.u32 1, %s3061_s19  }
  0x4f   : > { %p3260_p10 = por %p291_p8, %p46_p0  ;;  %p3264_p12 = por %p297_p9, %p52_p4 }
  0x50   : > { %s3675_s25 = scalar_select %p3253_p6, 1, 0 }
  0x51   : > { %s3676_s12 = scalar_select %p3260_p10, 1, 0 }
  0x52   : > { %s3677_s13 = scalar_select %p3264_p12, 1, 0 }
  0x53   : > { %s3268_s14 = sshll.u32 %s380_s27, 3  ;;  %s2444_s15 = sshll.u32 %s3065_s20, 7 }
  0x54   : > { %3678 = sst [smem:[#allocation23_spill]] %s3677_s13  ;;  %s3274_s22 = scalar_lea.hbm %s3636_s0, %s2444_s15 }
  0x55   : > { %s384_s28 = scalar_lea.vmem [#allocation2], %s3268_s14  ;;  %p3281_p13 = pnand %p2727_p11, %p3247_p2 }
  0x56   : > { %s391_s2 = sshll.u32 %s384_s28, 4  ;;  %s3288_s16 = scalar_lea.hbm %s3637_s1, %s2444_s15  ;;  %s3277_s2 = int_to_ptr.vmem [resolvable:$true] %s391_s2 }
  0x57   : > { %s398_s21 = sand.u32 1, %s3065_s20   ;;  %s381_s30 = scalar_lea.sflag [#allocation3], %s380_s27 }
  0x58   : > { %s2929_s19 = scalar_lea.hbm %s3274_s22, 128  ;;  %p2931_p0 = pneg %p3281_p13 }
  0x59   : > { %p2930_p7 = scmp.ne.s32.totalorder %s3274_s22, %s2929_s19  ;;  %s2934_s29 = scalar_lea.hbm %s3636_s0, 256 }
  0x5a   : > { %p2935_p2 = scmp.lt.s32.totalorder %s3274_s22, %s3636_s0  ;;  %p2936_p5 = scmp.lt.s32.totalorder %s2934_s29, %s2929_s19 }
  0x5b   : > { %p2932_p1 = pnand %p2931_p0, %p2930_p7 }
  0x5c   : > { %p2937_p8 = por %p2936_p5, %p2935_p2 }
  0x5d   : > { %p2933_p4 = pneg %p2932_p1 }
  0x5f   : > { %p2938_p9 = pnand %p2937_p8, %p2933_p4 }
  0x61   : > { %2941 = shalt.err (!%p2938_p9)
}
  0x62   : > { %s2942_s7 = scalar_lea.vmem %s3277_s2, 128  ;;  %s3073_s27 = smov [#allocation2]  }
  0x63   : > { %p2943_p11 = scmp.ne.s32.totalorder %s3277_s2, %s2942_s7  ;;  %s2947_s15 = sshll.u32 %s3073_s27, 4  ;;  %s2948_s15 = int_to_ptr.vmem [resolvable:$false] %s2947_s15 }
  0x64   : > { %s2949_s26 = scalar_lea.vmem %s2948_s15, 256  ;;  %p2950_p12 = scmp.lt.s32.totalorder %s3277_s2, %s2948_s15 }
  0x65   : > { %p2945_p7 = pnand %p2943_p11, %p2931_p0  ;;  %p2951_p10 = scmp.lt.s32.totalorder %s2949_s26, %s2942_s7 }
  0x67   : > { %p2946_p1 = pneg %p2945_p7  ;;  %p2952_p6 = por %p2951_p10, %p2950_p12 }
  0x69   : > { %p2953_p2 = pnand %p2952_p6, %p2946_p1 }
  0x6b   : > { %2956 = shalt.err (!%p2953_p2)
}
  0x6c   : > { %2715 = dma.hbm_to_vmem [thread:$0]  (!%p3281_p13), %s3274_s22, 128, %s3277_s2, %s381_s30  }
  0x6d   : > { %s402_s19 = scalar_lea.vmem [#allocation5], %s3268_s14  ;;  %s399_s13 = scalar_lea.sflag [#allocation6], %s398_s21 }
  0x6e   : > { %s409_s29 = sshll.u32 %s402_s19, 4  ;;  %s2957_s28 = scalar_lea.hbm %s3288_s16, 128  ;;  %s410_s29 = int_to_ptr.vmem [resolvable:$true] %s409_s29 }
  0x6f   : > { %p2958_p10 = scmp.ne.s32.totalorder %s3288_s16, %s2957_s28  ;;  %s2962_s27 = scalar_lea.hbm %s3637_s1, 256 }
  0x70   : > { %p2963_p4 = scmp.lt.s32.totalorder %s3288_s16, %s3637_s1  ;;  %p2964_p5 = scmp.lt.s32.totalorder %s2962_s27, %s2957_s28 }
  0x71   : > { %p2960_p6 = pnand %p2958_p10, %p2931_p0 }
  0x72   : > { %p2965_p8 = por %p2964_p5, %p2963_p4 }
  0x73   : > { %p2961_p12 = pneg %p2960_p6 }
  0x75   : > { %p2966_p9 = pnand %p2965_p8, %p2961_p12 }
  0x77   : > { %2969 = shalt.err (!%p2966_p9)
}
  0x78   : > { %s2970_s2 = scalar_lea.vmem %s410_s29, 128  ;;  %s3074_s30 = smov [#allocation5]  }
  0x79   : > { %p2971_p11 = scmp.ne.s32.totalorder %s410_s29, %s2970_s2  ;;  %s2975_s14 = sshll.u32 %s3074_s30, 4  ;;  %s2976_s14 = int_to_ptr.vmem [resolvable:$false] %s2975_s14 }
  0x7a   : > { %s2977_s22 = scalar_lea.vmem %s2976_s14, 256  ;;  %p2978_p2 = scmp.lt.s32.totalorder %s410_s29, %s2976_s14 }
  0x7b   : > { %p2973_p7 = pnand %p2971_p11, %p2931_p0  ;;  %p2979_p10 = scmp.lt.s32.totalorder %s2977_s22, %s2970_s2 }
  0x7d   : > { %p2974_p1 = pneg %p2973_p7  ;;  %p2980_p6 = por %p2979_p10, %p2978_p2 }
  0x7f   : > { %p2981_p3 = pnand %p2980_p6, %p2974_p1 }
  0x81   : > { %2984 = shalt.err (!%p2981_p3)
}
  0x82   : > { %2718 = dma.hbm_to_vmem [thread:$0]  (!%p3281_p13), %s3288_s16, 128, %s410_s29, %s399_s13  }
  0x83   : > { %p3680_p12 = scmp.ne.s32.totalorder %s3665_s24, 0 }
  0x84   : > { %s3339_s21 = sand.u32 (!%p3680_p12), 1, %s3057_s18   ;;  %p3681_p0 = scmp.ne.s32.totalorder (!%p3680_p12), %s3675_s25, 0 }
  0x85   : > { %418 = sbr.rel (%p3680_p12) target bundleno = 3771 (0xebb), region = 64  ;;  %s3342_s19 = sshll.u32 (!%p3680_p12), %s3339_s21, 3 }
  0x86   : > { %s421_s28 = scalar_lea.sflag (!%p3680_p12), [#allocation3], %s3339_s21  ;;  %s424_s5 = scalar_lea.vmem (!%p3680_p12), [#allocation2], %s3342_s19 }
  0x8a   : > { %3028 = dma.done.wait (%p3681_p0), %s421_s28, 128  }
  0x8b   : > { %3030 = vsyncadd (%p3681_p0), %s421_s28, 4294967168  ;;  %s429_s4 = sand.u32 1, %s3173_s23   ;;  %s433_s16 = scalar_lea.vmem [#allocation5], %s3342_s19 }
  0x8c   : > { %s430_s24 = scalar_lea.sflag [#allocation6], %s429_s4 }
  0x8d   : > { %3032 = dma.done.wait (%p3681_p0), %s430_s24, 128  }
  0x8e   : > { %3034 = vsyncadd (%p3681_p0), %s430_s24, 4294967168  ;;  %p3682_p3 = scmp.eq.s32.totalorder %s3173_s23, 0 }
  0x90   : > { %3036 = dma.done.wait (%p3682_p3), [#allocation6], 128   ;;  %p3683_p13 = pmov %p3682_p3 }
  0x91   : > { %p3684_p4 = pmov %p3682_p3 }
  0x92   : > { %3038 = vsyncadd (%p3683_p13), [#allocation6], 4294967168 }
  0x93   : > { %3040 = dma.done.wait (%p3684_p4), [#allocation9], 1040   ;;  %p3685_p5 = pmov %p3682_p3 }
  0x94   : > { %p3686_p8 = pmov %p3682_p3 }
  0x95   : > { %3042 = vsyncadd (%p3685_p5), [#allocation9], 4294966256 }
  0x96   : > { %3044 = dma.done.wait (%p3686_p8), [#allocation12], 1024   ;;  %p3687_p9 = pmov %p3682_p3 }
  0x97   : > { %v493_v0 = vld [vmem:[%s424_s5] sm:$0xff]  ;;  %vm499_vm0 = vcmask 261120   ;;  %v3075_v11 = vmov 0.0   ;;  %vm3076_vm1 = vmmov 0   ;;  %v530_v13 = vld [vmem:[#allocation10 + $0x8] sm:$0xff]  ;;  %s3077_s27 = smov 120  }
  0x98   : > { %3046 = vsyncadd (%p3687_p9), [#allocation12], 4294966272  ;;  %v495_v1 = vld [vmem:[#allocation7] sm:$0xff]  ;;  %v494_v2 = vmul.f32 2.0, %v493_v0  ;;  %2553 = vmatprep.subr.mxu0 %v3075_v11  ;;  %2561 = vmatprep.mubr.msk.f32.mxu0 %vm3076_vm1, %v3075_v11  ;;  %v529_v14 = vld [vmem:[#allocation10] sm:$0xff]  ;;  %s3078_s15 = smov 96  }
  0x99   : > { %v532_v10 = vld [vmem:[#allocation10 + $0x18] sm:$0xff]  ;;  %v531_v12 = vld [vmem:[#allocation10 + $0x10] sm:$0xff]  ;;  %2564 = vmatprep.subr.mxu1 %v3075_v11  ;;  %2566 = vmatprep.mubr.msk.f32.mxu1 %vm3076_vm1, %v3075_v11  ;;  %s3079_s26 = smov 88   ;;  %s3080_s2 = smov 80   ;;  %vm616_vm2 = vcmask 64512   ;;  %vm1290_vm3 = vcmask 130048  }
  0x9a   : > { %v496_v3 = vadd.f32 %v495_v1, %v494_v2  ;;  %2554 = vmatpush3.msra.mxu0 %v532_v10  ;;  %v2455_v19 = vld [vmem:[%s3639_s3] ss:$0 sm:$0xff]  ;;  %v2456_v21 = vld [vmem:[#allocation8] ss:$0 sm:$0xff]  ;;  %s3081_s30 = smov 112   ;;  %s3082_s14 = smov 72  }
  0x9b   : > { %2555 = vmatprep.subr.mxu0 %v3075_v11  ;;  %v2457_v24 = vld [vmem:[%s3642_s6] ss:$0 sm:$0xff]  ;;  %s3083_s22 = smov 104   ;;  %v3431_v35 = vld [vmem:[%s433_s16] sm:$0xff]  ;;  %s3084_s28 = smov 64   ;;  %vm1292_vm4 = vcmask 195584  }
  0x9c   : > { %v500_v4 = vsel %vm499_vm0, %v496_v3, 0.0  ;;  %2556 = vmatpush3.msra.mxu0 %v531_v12  ;;  %s3085_s5 = smov 48   ;;  %s3086_s4 = smov 40  }
  0x9d   : > { %501 = vadd.xlane.f32.xlu0 %v500_v4  ;;  %2557 = vmatprep.subr.mxu0 %v3075_v11  ;;  %s3659_s24 = smov 56   ;;  %s3658_s16 = smov 8  }
  0x9e   : > { %2558 = vmatpush3.msra.mxu0 %v530_v13  ;;  %s3657_s25 = smov 16   ;;  %s3656_s29 = smov 24  }
  0x9f   : > { %2559 = vmatprep.subr.mxu0 %v3075_v11  ;;  %p3692_p7 = scmp.ne.s32.totalorder %s3676_s12, 0 }
  0xa0   : > { %2560 = vmatpush3.msra.mxu0 %v529_v14 }
  0xa1   : > { %2584 = vmatprep.subr.mxu0 %v3075_v11 }
 0x126   : > { %v502_v5 = vpop.xlane.xlu0 %501 }
 0x127   : > { %v504_v6 = vmul.f32 0.03125, %v502_v5 }
 0x129   : > { %v505_v7 = vsub.f32 %v496_v3, %v504_v6 }
 0x12b   : > { %v506_v8 = vmul.f32 %v505_v7, %v505_v7 }
 0x12d   : > { %v507_v9 = vsel %vm499_vm0, %v506_v8, 0.0 }
 0x12e   : > { %508 = vadd.xlane.f32.xlu0 %v507_v9 }
 0x1b7   : > { %v509_v15 = vpop.xlane.xlu0 %508 }
 0x1b8   : > { %v510_v16 = vmul.f32 0.03125, %v509_v15 }
 0x1ba   : > { %v511_v17 = vadd.f32 1e-12, %v510_v16 }
 0x1bc   : > { %2787 = vrsqrt.f32 %v511_v17 }
 0x1c9   : > { %v2788_v18 = vpop.eup %2787 }
 0x1ca   : > { %v513_v20 = vmul.f32 %v2788_v18, %v505_v7 }
 0x1cc   : > { %v520_v22 = vmul.f32 %v2455_v19, %v513_v20 }
 0x1ce   : > { %v3383_v23 = vadd.f32 %v2456_v21, %v520_v22 }
 0x1d0   : > { %2562 = vmatmul.mubr.msk.f32.vlgmr.msra.gmra.mxu0 %vm499_vm0, %v3383_v23 }
 0x1d1   : > { %2586 = vmatprep.mubr.msk.f32.mxu0 %vm3076_vm1, %v3075_v11 }
 0x290   : > { %v609_v25 = vpop.f32.mrf.mxu0 }
 0x291   : > { %v3392_v26 = vadd.f32 %v2457_v24, %v609_v25 }
 0x292   : > { %v2563_v27 = vpop.f32.mrf.mxu0 }
 0x293   : > { %691 = vrot.lane.b32.xlu0 %v3392_v26, %s3077_s27  ;;  %614 = vrot.lane.b32.xlu1 %v3392_v26, %s3078_s15  ;;  %v1296_v27 = vld [vmem:[#allocation11 + $0x10] sm:$0xff] }
 0x297   : > { %693 = vrot.lane.b32.xlu1 %v3392_v26, %s3079_s26 }
 0x29b   : > { %771 = vrot.lane.b32.xlu1 %v3392_v26, %s3080_s2 }
 0x29f   : > { %769 = vrot.lane.b32.xlu1 %v3392_v26, %s3081_s30 }
 0x2a3   : > { %849 = vrot.lane.b32.xlu1 %v3392_v26, %s3082_s14 }
 0x2a7   : > { %847 = vrot.lane.b32.xlu1 %v3392_v26, %s3083_s22 }
 0x305   : > { %v615_v28 = vpop.permute.xlu1 %614  ;;  %v692_v30 = vpop.permute.xlu0 %691 }
 0x306   : > { %2565 = vmatpush3.xpose.msk.msra.mxu1 %vm616_vm2, %v615_v28  ;;  %v1295_v28 = vld [vmem:[#allocation11 + $0x8] sm:$0xff] }
 0x307   : > { %2569 = vmatprep.subr.mxu1 %v3075_v11 }
 0x309   : > { %2567 = vmatmul.mubr.msk.f32.vlgmr.msra.gmra.mxu1 %vm616_vm2, %v3392_v26  ;;  %v694_v29 = vpop.permute.xlu1 %693 }
 0x30a   : > { %2570 = vmatpush3.xpose.msk.msra.mxu1 %vm616_vm2, %v694_v29  ;;  %2571 = vmatprep.mubr.msk.f32.mxu1 %vm3076_vm1, %v3075_v11 }
 0x30b   : > { %2574 = vmatprep.subr.mxu1 %v3075_v11 }
 0x30d   : > { %2572 = vmatmul.mubr.msk.f32.vlgmr.msra.gmra.mxu1 %vm616_vm2, %v692_v30  ;;  %v772_v31 = vpop.permute.xlu1 %771 }
 0x30e   : > { %2575 = vmatpush3.xpose.msk.msra.mxu1 %vm616_vm2, %v772_v31  ;;  %2576 = vmatprep.mubr.msk.f32.mxu1 %vm3076_vm1, %v3075_v11  ;;  %v1294_v31 = vld [vmem:[#allocation11] sm:$0xff] }
 0x30f   : > { %2579 = vmatprep.subr.mxu1 %v3075_v11 }
 0x311   : > { %v770_v32 = vpop.permute.xlu1 %769 }
 0x312   : > { %2577 = vmatmul.mubr.msk.f32.vlgmr.msra.gmra.mxu1 %vm616_vm2, %v770_v32 }
 0x313   : > { %2581 = vmatprep.mubr.msk.f32.mxu1 %vm3076_vm1, %v3075_v11 }
 0x315   : > { %v850_v33 = vpop.permute.xlu1 %849 }
 0x316   : > { %2580 = vmatpush3.xpose.msk.msra.mxu1 %vm616_vm2, %v850_v33 }
 0x317   : > { %2589 = vmatprep.subr.mxu1 %v3075_v11 }
 0x319   : > { %v848_v34 = vpop.permute.xlu1 %847 }
 0x31a   : > { %2582 = vmatmul.mubr.msk.f32.vlgmr.msra.gmra.mxu1 %vm616_vm2, %v848_v34 }
 0x31b   : > { %2591 = vmatprep.mubr.msk.f32.mxu1 %vm3076_vm1, %v3075_v11 }
 0x3c9   : > { %v687_v36 = vpop.f32.mrf.mxu1 }
 0x3ca   : > { %v925_v37 = vadd.f32 %v687_v36, %v3431_v35 }
 0x3cb   : > { %v2568_v38 = vpop.f32.mrf.mxu1 }
 0x3cc   : > { %v929_v39 = vsel %vm616_vm2, %v925_v37, -inf }
 0x3cd   : > { %930 = vmax.xlane.f32.xlu1 %v929_v39  ;;  %v765_v40 = vpop.f32.mrf.mxu1 }
 0x3ce   : > { %v926_v41 = vadd.f32 %v765_v40, %v3431_v35 }
 0x3cf   : > { %v2573_v42 = vpop.f32.mrf.mxu1 }
 0x3d0   : > { %v932_v43 = vsel %vm616_vm2, %v926_v41, -inf }
 0x3d1   : > { %933 = vmax.xlane.f32.xlu0 %v932_v43 }
 0x3d2   : > { %v843_v44 = vpop.f32.mrf.mxu1 }
 0x3d3   : > { %v927_v45 = vadd.f32 %v843_v44, %v3431_v35 }
 0x3d4   : > { %v2578_v46 = vpop.f32.mrf.mxu1 }
 0x3d5   : > { %v935_v47 = vsel %vm616_vm2, %v927_v45, -inf }
 0x3d6   : > { %936 = vmax.xlane.f32.xlu1 %v935_v47 }
 0x3da   : > { %v921_v48 = vpop.f32.mrf.mxu1 }
 0x3db   : > { %v928_v49 = vadd.f32 %v921_v48, %v3431_v35 }
 0x3dc   : > { %v2583_v50 = vpop.f32.mrf.mxu1 }
 0x3dd   : > { %v938_v51 = vsel %vm616_vm2, %v928_v49, -inf }
 0x3de   : > { %939 = vmax.xlane.f32.xlu0 %v938_v51 }
 0x3e7   : > { %973 = vrot.lane.b32.xlu1 %v3392_v26, %s3084_s28 }
 0x456   : > { %v931_v52 = vpop.xlane.xlu1 %930 }
 0x457   : > { %v941_v53 = vsub.f32 %v925_v37, %v931_v52 }
 0x459   : > { %v945_v54 = vmul.f32 1.442695, %v941_v53 }
 0x45a   : > { %v934_v55 = vpop.xlane.xlu0 %933 }
 0x45b   : > { %2789 = vpow2.f32 %v945_v54  ;;  %v942_v56 = vsub.f32 %v926_v41, %v934_v55 }
 0x45d   : > { %v947_v57 = vmul.f32 1.442695, %v942_v56  ;;  %v1412_v56 = vld [vmem:[#allocation10 + $0x38] sm:$0xff] }
 0x45f   : > { %2791 = vpow2.f32 %v947_v57  ;;  %v937_v58 = vpop.xlane.xlu1 %936  ;;  %v1411_v57 = vld [vmem:[#allocation10 + $0x30] sm:$0xff] }
 0x460   : > { %v943_v59 = vsub.f32 %v927_v45, %v937_v58  ;;  %v2471_v45 = vld [vmem:[%s3644_s8] ss:$0 sm:$0xff]  ;;  %v1410_v58 = vld [vmem:[#allocation10 + $0x28] sm:$0xff] }
 0x462   : > { %v949_v60 = vmul.f32 1.442695, %v943_v59 }
 0x463   : > { %v974_v61 = vpop.permute.xlu1 %973 }
 0x464   : > { %2793 = vpow2.f32 %v949_v60  ;;  %2585 = vmatpush3.msra.mxu0 %v974_v61 }
 0x465   : > { %2594 = vmatprep.subr.mxu0 %v3075_v11 }
 0x467   : > { %v940_v62 = vpop.xlane.xlu0 %939 }
 0x468   : > { %v2790_v63 = vpop.eup %2789  ;;  %v944_v0 = vsub.f32 %v928_v49, %v940_v62 }
 0x469   : > { %v953_v1 = vsel %vm616_vm2, %v2790_v63, 0.0 }
 0x46a   : > { %v951_v2 = vmul.f32 1.442695, %v944_v0  ;;  %954 = vadd.xlane.f32.xlu1 %v953_v1  ;;  %v2474_v1 = vld [vmem:[%s3646_s10] ss:$0 sm:$0xff] }
 0x46c   : > { %v2792_v3 = vpop.eup %2791  ;;  %2795 = vpow2.f32 %v951_v2 }
 0x46d   : > { %v956_v4 = vsel %vm616_vm2, %v2792_v3, 0.0 }
 0x46e   : > { %957 = vadd.xlane.f32.xlu0 %v956_v4  ;;  %v2476_v4 = vld [vmem:[%s3642_s6 + $0x1] ss:$0 sm:$0xff] }
 0x471   : > { %v2794_v5 = vpop.eup %2793 }
 0x472   : > { %v959_v6 = vsel %vm616_vm2, %v2794_v5, 0.0 }
 0x473   : > { %960 = vadd.xlane.f32.xlu1 %v959_v6 }
 0x479   : > { %v2796_v7 = vpop.eup %2795 }
 0x47a   : > { %v962_v8 = vsel %vm616_vm2, %v2796_v7, 0.0 }
 0x47b   : > { %963 = vadd.xlane.f32.xlu0 %v962_v8 }
 0x484   : > { %1125 = vrot.lane.b32.xlu1 %v3392_v26, %s3085_s5 }
 0x488   : > { %1201 = vrot.lane.b32.xlu1 %v3392_v26, %s3086_s4 }
 0x491   : > { %1049 = vrot.lane.b32.xlu0 %v3392_v26, %s3659_s24  ;;  %v1297_v26 = vld [vmem:[#allocation11 + $0x18] sm:$0xff]  ;;  %s2498_s24 = sshll.u32 %s3173_s23, 7 }
 0x492   : > { %s2303_s7 = scalar_lea.hbm %s3647_s11, %s2498_s24 }
 0x4f3   : > { %v955_v9 = vpop.xlane.xlu1 %954 }
 0x4f4   : > { %2797 = vrcp.f32 %v955_v9 }
 0x4f7   : > { %v958_v10 = vpop.xlane.xlu0 %957 }
 0x4f8   : > { %2799 = vrcp.f32 %v958_v10 }
 0x4fc   : > { %v961_v12 = vpop.xlane.xlu1 %960 }
 0x4fd   : > { %2801 = vrcp.f32 %v961_v12 }
 0x500   : > { %v1126_v15 = vpop.permute.xlu1 %1125 }
 0x501   : > { %v2798_v13 = vpop.eup %2797 }
 0x502   : > { %v966_v14 = vmul.f32 %v2798_v13, %v2790_v63  ;;  %v2473_v63 = vld [vmem:[%s3645_s9] ss:$0 sm:$0xff] }
 0x504   : > { %v964_v16 = vpop.xlane.xlu0 %963  ;;  %2587 = vmatmul.mubr.msk.f32.vlgmr.msra.gmra.mxu0 %vm616_vm2, %v966_v14  ;;  %v1202_v21 = vpop.permute.xlu1 %1201 }
 0x505   : > { %v2800_v17 = vpop.eup %2799  ;;  %2803 = vrcp.f32 %v964_v16  ;;  %2595 = vmatpush3.msra.mxu0 %v1126_v15  ;;  %2596 = vmatprep.mubr.msk.f32.mxu0 %vm3076_vm1, %v3075_v11 }
 0x506   : > { %2604 = vmatprep.subr.mxu0 %v3075_v11  ;;  %v968_v19 = vmul.f32 %v2800_v17, %v2792_v3 }
 0x508   : > { %v1050_v18 = vpop.permute.xlu0 %1049 }
 0x509   : > { %2590 = vmatpush3.msra.mxu1 %v1050_v18 }
 0x50a   : > { %v2802_v20 = vpop.eup %2801  ;;  %2592 = vmatmul.mubr.msk.f32.vlgmr.msra.gmra.mxu1 %vm616_vm2, %v968_v19  ;;  %2599 = vmatprep.subr.mxu1 %v3075_v11 }
 0x50b   : > { %2600 = vmatpush3.msra.mxu1 %v1202_v21  ;;  %v970_v22 = vmul.f32 %v2802_v20, %v2794_v5  ;;  %2601 = vmatprep.mubr.msk.f32.mxu1 %vm3076_vm1, %v3075_v11 }
 0x50c   : > { %2615 = vmatprep.subr.mxu1 %v3075_v11 }
 0x50d   : > { %2597 = vmatmul.mubr.msk.f32.vlgmr.msra.gmra.mxu0 %vm616_vm2, %v970_v22 }
 0x50e   : > { %2612 = vmatprep.mubr.msk.f32.mxu0 %vm3076_vm1, %v3075_v11  ;;  %2605 = vmatpush3.msra.mxu0 %v1297_v26 }
 0x50f   : > { %2606 = vmatprep.subr.mxu0 %v3075_v11 }
 0x510   : > { %2607 = vmatpush3.msra.mxu0 %v1296_v27 }
 0x511   : > { %2608 = vmatprep.subr.mxu0 %v3075_v11 }
 0x512   : > { %v2804_v24 = vpop.eup %2803  ;;  %2609 = vmatpush3.msra.mxu0 %v1295_v28 }
 0x513   : > { %v972_v25 = vmul.f32 %v2804_v24, %v2796_v7  ;;  %2610 = vmatprep.subr.mxu0 %v3075_v11 }
 0x514   : > { %2611 = vmatpush3.msra.mxu0 %v1294_v31 }
 0x515   : > { %2602 = vmatmul.mubr.msk.f32.vlgmr.msra.gmra.mxu1 %vm616_vm2, %v972_v25  ;;  %2626 = vmatprep.subr.mxu0 %v3075_v11 }
 0x516   : > { %2623 = vmatprep.mubr.msk.f32.mxu1 %vm3076_vm1, %v3075_v11  ;;  %2616 = vmatpush3.msra.mxu1 %v1412_v56 }
 0x517   : > { %2617 = vmatprep.subr.mxu1 %v3075_v11 }
 0x518   : > { %2618 = vmatpush3.msra.mxu1 %v1411_v57 }
 0x519   : > { %2619 = vmatprep.subr.mxu1 %v3075_v11 }
 0x51a   : > { %2620 = vmatpush3.msra.mxu1 %v1410_v58 }
 0x51b   : > { %2621 = vmatprep.subr.mxu1 %v3075_v11 }
 0x5c4   : > { %v1045_v29 = vpop.f32.mrf.mxu0 }
 0x5c6   : > { %v2588_v30 = vpop.f32.mrf.mxu0 }
 0x5ca   : > { %v1121_v32 = vpop.f32.mrf.mxu1 }
 0x5cb   : > { %1278 = vrot.lane.b32.xlu0 %v1121_v32, %s3658_s16  ;;  %s492_s16 = scalar_lea.vmem [#allocation13], %s3342_s19 }
 0x5cc   : > { %v2593_v33 = vpop.f32.mrf.mxu1 }
 0x5cd   : > { %v1197_v34 = vpop.f32.mrf.mxu0 }
 0x5ce   : > { %1282 = vrot.lane.b32.xlu1 %v1197_v34, %s3657_s25  ;;  %s2305_s25 = sshll.u32 %s492_s16, 4  ;;  %s2306_s25 = int_to_ptr.vmem [resolvable:$true] %s2305_s25 }
 0x5cf   : > { %v2598_v36 = vpop.f32.mrf.mxu0 }
 0x5d5   : > { %v1273_v37 = vpop.f32.mrf.mxu1 }
 0x5d6   : > { %1286 = vrot.lane.b32.xlu0 %v1273_v37, %s3656_s29 }
 0x5d7   : > { %v2603_v38 = vpop.f32.mrf.mxu1 }
 0x63d   : > { %v1279_v39 = vpop.permute.xlu0 %1278 }
 0x63e   : > { %v1289_v41 = vsel %vm616_vm2, %v1045_v29, %v1279_v39 }
 0x640   : > { %v1283_v40 = vpop.permute.xlu1 %1282 }
 0x641   : > { %v1291_v42 = vsel %vm1290_vm3, %v1289_v41, %v1283_v40 }
 0x648   : > { %v1287_v43 = vpop.permute.xlu0 %1286 }
 0x649   : > { %v1293_v44 = vsel %vm1292_vm4, %v1291_v42, %v1287_v43 }
 0x64a   : > { %2613 = vmatmul.mubr.msk.f32.vlgmr.msra.gmra.mxu0 %vm499_vm0, %v1293_v44 }
 0x64b   : > { %2628 = vmatprep.mubr.msk.f32.mxu0 %vm3076_vm1, %v3075_v11 }
 0x70a   : > { %v1374_v46 = vpop.f32.mrf.mxu0 }
 0x70b   : > { %v1375_v47 = vadd.f32 %v2471_v45, %v1374_v46 }
 0x70c   : > { %v2614_v48 = vpop.f32.mrf.mxu0 }
 0x70d   : > { %v1378_v49 = vadd.f32 %v1375_v47, %v3383_v23  ;;  %v1409_v23 = vld [vmem:[#allocation10 + $0x20] sm:$0xff] }
 0x70e   : > { %2622 = vmatpush3.msra.mxu1 %v1409_v23 }
 0x70f   : > { %v1381_v50 = vsel %vm499_vm0, %v1378_v49, 0.0  ;;  %2631 = vmatprep.subr.mxu1 %v3075_v11 }
 0x710   : > { %1382 = vadd.xlane.f32.xlu1 %v1381_v50 }
 0x799   : > { %v1383_v51 = vpop.xlane.xlu1 %1382 }
 0x79a   : > { %v1384_v52 = vmul.f32 0.03125, %v1383_v51 }
 0x79c   : > { %v1385_v53 = vsub.f32 %v1378_v49, %v1384_v52 }
 0x79e   : > { %v1386_v54 = vmul.f32 %v1385_v53, %v1385_v53 }
 0x7a0   : > { %v1387_v55 = vsel %vm499_vm0, %v1386_v54, 0.0 }
 0x7a1   : > { %1388 = vadd.xlane.f32.xlu0 %v1387_v55 }
 0x82a   : > { %v1389_v59 = vpop.xlane.xlu0 %1388 }
 0x82b   : > { %v1390_v60 = vmul.f32 0.03125, %v1389_v59 }
 0x82d   : > { %v1391_v61 = vadd.f32 1e-12, %v1390_v60 }
 0x82f   : > { %2805 = vrsqrt.f32 %v1391_v61 }
 0x83c   : > { %v2806_v62 = vpop.eup %2805 }
 0x83d   : > { %v1393_v0 = vmul.f32 %v2806_v62, %v1385_v53 }
 0x83f   : > { %v1400_v2 = vmul.f32 %v2473_v63, %v1393_v0 }
 0x841   : > { %v3498_v3 = vadd.f32 %v2474_v1, %v1400_v2 }
 0x843   : > { %2624 = vmatmul.mubr.msk.f32.vlgmr.msra.gmra.mxu1 %vm499_vm0, %v3498_v3 }
 0x844   : > { %2633 = vmatprep.mubr.msk.f32.mxu1 %vm3076_vm1, %v3075_v11 }
 0x903   : > { %v1490_v5 = vpop.f32.mrf.mxu1 }
 0x904   : > { %v3507_v6 = vadd.f32 %v2476_v4, %v1490_v5  ;;  %v2176_v5 = vld [vmem:[#allocation11 + $0x38] sm:$0xff] }
 0x905   : > { %v2625_v7 = vpop.f32.mrf.mxu1 }
 0x906   : > { %1573 = vrot.lane.b32.xlu1 %v3507_v6, %s3079_s26  ;;  %1495 = vrot.lane.b32.xlu0 %v3507_v6, %s3078_s15  ;;  %v2174_v7 = vld [vmem:[#allocation11 + $0x28] sm:$0xff]  ;;  %s3689_s15 = smov 8   ;;  %s3690_s26 = smov 16  }
 0x90a   : > { %1571 = vrot.lane.b32.xlu1 %v3507_v6, %s3077_s27  ;;  %1651 = vrot.lane.b32.xlu0 %v3507_v6, %s3080_s2  ;;  %s3688_s27 = smov 56   ;;  %s3691_s2 = smov 24  }
 0x90e   : > { %1729 = vrot.lane.b32.xlu1 %v3507_v6, %s3082_s14  ;;  %1649 = vrot.lane.b32.xlu0 %v3507_v6, %s3081_s30 }
 0x912   : > { %1727 = vrot.lane.b32.xlu1 %v3507_v6, %s3083_s22 }
 0x978   : > { %v1574_v8 = vpop.permute.xlu1 %1573  ;;  %v1496_v9 = vpop.permute.xlu0 %1495 }
 0x979   : > { %2627 = vmatpush3.xpose.msk.msra.mxu0 %vm616_vm2, %v1496_v9  ;;  %2632 = vmatpush3.xpose.msk.msra.mxu1 %vm616_vm2, %v1574_v8  ;;  %v2173_v8 = vld [vmem:[#allocation11 + $0x20] sm:$0xff] }
 0x97a   : > { %2636 = vmatprep.subr.mxu0 %v3075_v11  ;;  %2641 = vmatprep.subr.mxu1 %v3075_v11 }
 0x97c   : > { %v1572_v10 = vpop.permute.xlu1 %1571  ;;  %2629 = vmatmul.mubr.msk.f32.vlgmr.msra.gmra.mxu0 %vm616_vm2, %v3507_v6  ;;  %v1652_v12 = vpop.permute.xlu0 %1651 }
 0x97d   : > { %2634 = vmatmul.mubr.msk.f32.vlgmr.msra.gmra.mxu1 %vm616_vm2, %v1572_v10  ;;  %2637 = vmatpush3.xpose.msk.msra.mxu0 %vm616_vm2, %v1652_v12 }
 0x97e   : > { %2638 = vmatprep.mubr.msk.f32.mxu0 %vm3076_vm1, %v3075_v11  ;;  %2643 = vmatprep.mubr.msk.f32.mxu1 %vm3076_vm1, %v3075_v11 }
 0x97f   : > { %2646 = vmatprep.subr.mxu0 %v3075_v11 }
 0x980   : > { %v1730_v13 = vpop.permute.xlu1 %1729  ;;  %v1650_v14 = vpop.permute.xlu0 %1649 }
 0x981   : > { %2639 = vmatmul.mubr.msk.f32.vlgmr.msra.gmra.mxu0 %vm616_vm2, %v1650_v14  ;;  %2642 = vmatpush3.xpose.msk.msra.mxu1 %vm616_vm2, %v1730_v13 }
 0x982   : > { %2651 = vmatprep.subr.mxu1 %v3075_v11  ;;  %2648 = vmatprep.mubr.msk.f32.mxu0 %vm3076_vm1, %v3075_v11 }
 0x984   : > { %v1728_v15 = vpop.permute.xlu1 %1727 }
 0x985   : > { %2644 = vmatmul.mubr.msk.f32.vlgmr.msra.gmra.mxu1 %vm616_vm2, %v1728_v15 }
 0x986   : > { %2653 = vmatprep.mubr.msk.f32.mxu1 %vm3076_vm1, %v3075_v11 }
 0xa3c   : > { %v1567_v16 = vpop.f32.mrf.mxu0 }
 0xa3d   : > { %v1805_v17 = vadd.f32 %v1567_v16, %v3431_v35  ;;  %v1645_v18 = vpop.f32.mrf.mxu1 }
 0xa3e   : > { %v1806_v19 = vadd.f32 %v1645_v18, %v3431_v35  ;;  %v2630_v20 = vpop.f32.mrf.mxu0 }
 0xa3f   : > { %v2635_v21 = vpop.f32.mrf.mxu1  ;;  %v1809_v22 = vsel %vm616_vm2, %v1805_v17, -inf }
 0xa40   : > { %1810 = vmax.xlane.f32.xlu0 %v1809_v22  ;;  %v1812_v24 = vsel %vm616_vm2, %v1806_v19, -inf }
 0xa41   : > { %1813 = vmax.xlane.f32.xlu1 %v1812_v24  ;;  %v1723_v25 = vpop.f32.mrf.mxu0  ;;  %v2491_v24 = vld [vmem:[%s3644_s8 + $0x1] ss:$0 sm:$0xff] }
 0xa42   : > { %v1807_v26 = vadd.f32 %v1723_v25, %v3431_v35 }
 0xa43   : > { %v2640_v27 = vpop.f32.mrf.mxu0 }
 0xa44   : > { %v1815_v28 = vsel %vm616_vm2, %v1807_v26, -inf }
 0xa45   : > { %v1801_v29 = vpop.f32.mrf.mxu1  ;;  %1816 = vmax.xlane.f32.xlu0 %v1815_v28 }
 0xa46   : > { %v1808_v30 = vadd.f32 %v1801_v29, %v3431_v35 }
 0xa47   : > { %v2645_v31 = vpop.f32.mrf.mxu1 }
 0xa48   : > { %v1818_v32 = vsel %vm616_vm2, %v1808_v30, -inf }
 0xa49   : > { %1819 = vmax.xlane.f32.xlu0 %v1818_v32 }
 0xa52   : > { %1853 = vrot.lane.b32.xlu1 %v3507_v6, %s3084_s28 }
 0xac9   : > { %v1811_v33 = vpop.xlane.xlu0 %1810 }
 0xaca   : > { %v1821_v34 = vsub.f32 %v1805_v17, %v1811_v33  ;;  %v1814_v36 = vpop.xlane.xlu1 %1813 }
 0xacb   : > { %v1822_v37 = vsub.f32 %v1806_v19, %v1814_v36 }
 0xacc   : > { %v1825_v38 = vmul.f32 1.442695, %v1821_v34 }
 0xacd   : > { %v1827_v39 = vmul.f32 1.442695, %v1822_v37 }
 0xace   : > { %2807 = vpow2.f32 %v1825_v38  ;;  %v1854_v40 = vpop.permute.xlu1 %1853  ;;  %v1817_v41 = vpop.xlane.xlu0 %1816 }
 0xacf   : > { %2809 = vpow2.f32 %v1827_v39  ;;  %v1823_v42 = vsub.f32 %v1807_v26, %v1817_v41  ;;  %2647 = vmatpush3.msra.mxu0 %v1854_v40  ;;  %v2496_v41 = vld [vmem:[%s3646_s10 + $0x1] ss:$0 sm:$0xff] }
 0xad0   : > { %2656 = vmatprep.subr.mxu0 %v3075_v11 }
 0xad1   : > { %v1829_v35 = vmul.f32 1.442695, %v1823_v42 }
 0xad2   : > { %v1820_v43 = vpop.xlane.xlu0 %1819 }
 0xad3   : > { %2811 = vpow2.f32 %v1829_v35  ;;  %v1824_v44 = vsub.f32 %v1808_v30, %v1820_v43 }
 0xad5   : > { %v1831_v45 = vmul.f32 1.442695, %v1824_v44 }
 0xad7   : > { %2813 = vpow2.f32 %v1831_v45 }
 0xadb   : > { %v2808_v46 = vpop.eup %2807 }
 0xadc   : > { %v2810_v47 = vpop.eup %2809  ;;  %v1833_v48 = vsel %vm616_vm2, %v2808_v46, 0.0 }
 0xadd   : > { %1834 = vadd.xlane.f32.xlu1 %v1833_v48  ;;  %v1836_v49 = vsel %vm616_vm2, %v2810_v47, 0.0 }
 0xade   : > { %1837 = vadd.xlane.f32.xlu0 %v1836_v49 }
 0xae0   : > { %v2812_v50 = vpop.eup %2811 }
 0xae1   : > { %v1839_v51 = vsel %vm616_vm2, %v2812_v50, 0.0 }
 0xae2   : > { %1840 = vadd.xlane.f32.xlu1 %v1839_v51 }
 0xae4   : > { %v2814_v52 = vpop.eup %2813 }
 0xae5   : > { %v1842_v53 = vsel %vm616_vm2, %v2814_v52, 0.0 }
 0xae6   : > { %1843 = vadd.xlane.f32.xlu0 %v1842_v53 }
 0xaf3   : > { %2005 = vrot.lane.b32.xlu1 %v3507_v6, %s3085_s5 }
 0xaf7   : > { %2081 = vrot.lane.b32.xlu1 %v3507_v6, %s3086_s4 }
 0xafc   : > { %1929 = vrot.lane.b32.xlu0 %v3507_v6, %s3688_s27  ;;  %v2175_v6 = vld [vmem:[#allocation11 + $0x30] sm:$0xff]  ;;  %s2292_s27 = scalar_lea.sflag [#allocation4], %s3339_s21 }
 0xb66   : > { %v1835_v54 = vpop.xlane.xlu1 %1834 }
 0xb67   : > { %2815 = vrcp.f32 %v1835_v54  ;;  %v1838_v55 = vpop.xlane.xlu0 %1837 }
 0xb68   : > { %2817 = vrcp.f32 %v1838_v55 }
 0xb6b   : > { %v1841_v56 = vpop.xlane.xlu1 %1840 }
 0xb6c   : > { %2819 = vrcp.f32 %v1841_v56 }
 0xb6f   : > { %v1844_v57 = vpop.xlane.xlu0 %1843  ;;  %v2006_v58 = vpop.permute.xlu1 %2005 }
 0xb70   : > { %2821 = vrcp.f32 %v1844_v57 }
 0xb73   : > { %v1930_v23 = vpop.permute.xlu0 %1929  ;;  %v2082_v63 = vpop.permute.xlu1 %2081 }
 0xb74   : > { %v2816_v59 = vpop.eup %2815  ;;  %2652 = vmatpush3.msra.mxu1 %v1930_v23 }
 0xb75   : > { %v2818_v60 = vpop.eup %2817  ;;  %v1846_v61 = vmul.f32 %v2816_v59, %v2808_v46  ;;  %2661 = vmatprep.subr.mxu1 %v3075_v11 }
 0xb76   : > { %v1848_v62 = vmul.f32 %v2818_v60, %v2810_v47 }
 0xb77   : > { %2649 = vmatmul.mubr.msk.f32.vlgmr.msra.gmra.mxu0 %vm616_vm2, %v1846_v61 }
 0xb78   : > { %2657 = vmatpush3.msra.mxu0 %v2006_v58  ;;  %2654 = vmatmul.mubr.msk.f32.vlgmr.msra.gmra.mxu1 %vm616_vm2, %v1848_v62 }
 0xb79   : > { %v2820_v0 = vpop.eup %2819  ;;  %2662 = vmatpush3.msra.mxu1 %v2082_v63  ;;  %2658 = vmatprep.mubr.msk.f32.mxu0 %vm3076_vm1, %v3075_v11 }
 0xb7a   : > { %v1850_v1 = vmul.f32 %v2820_v0, %v2812_v50  ;;  %2663 = vmatprep.mubr.msk.f32.mxu1 %vm3076_vm1, %v3075_v11  ;;  %2666 = vmatprep.subr.mxu0 %v3075_v11 }
 0xb7c   : > { %2659 = vmatmul.mubr.msk.f32.vlgmr.msra.gmra.mxu0 %vm616_vm2, %v1850_v1 }
 0xb7d   : > { %v2822_v2 = vpop.eup %2821  ;;  %2674 = vmatprep.mubr.msk.f32.mxu0 %vm3076_vm1, %v3075_v11  ;;  %2667 = vmatpush3.msra.mxu0 %v2176_v5 }
 0xb7e   : > { %v1852_v4 = vmul.f32 %v2822_v2, %v2814_v52  ;;  %2668 = vmatprep.subr.mxu0 %v3075_v11 }
 0xb7f   : > { %2669 = vmatpush3.msra.mxu0 %v2175_v6 }
 0xb80   : > { %2664 = vmatmul.mubr.msk.f32.vlgmr.msra.gmra.mxu1 %vm616_vm2, %v1852_v4  ;;  %2670 = vmatprep.subr.mxu0 %v3075_v11 }
 0xb81   : > { %2671 = vmatpush3.msra.mxu0 %v2174_v7 }
 0xb82   : > { %2672 = vmatprep.subr.mxu0 %v3075_v11 }
 0xb83   : > { %2673 = vmatpush3.msra.mxu0 %v2173_v8 }
 0xc37   : > { %v1925_v9 = vpop.f32.mrf.mxu0 }
 0xc38   : > { %v2001_v10 = vpop.f32.mrf.mxu1 }
 0xc39   : > { %2158 = vrot.lane.b32.xlu0 %v2001_v10, %s3689_s15  ;;  %v2650_v12 = vpop.f32.mrf.mxu0  ;;  %s2985_s15 = scalar_lea.vmem %s2306_s25, 128 }
 0xc3a   : > { %v2655_v13 = vpop.f32.mrf.mxu1  ;;  %p2986_p11 = scmp.ne.s32.totalorder %s2306_s25, %s2985_s15 }
 0xc3c   : > { %v2077_v14 = vpop.f32.mrf.mxu0  ;;  %p2987_p1 = pnand %p2986_p11, %p3692_p7 }
 0xc3d   : > { %2162 = vrot.lane.b32.xlu1 %v2077_v14, %s3690_s26  ;;  %s3091_s26 = smov [#allocation13]  }
 0xc3e   : > { %v2660_v15 = vpop.f32.mrf.mxu0  ;;  %p2988_p2 = pneg %p2987_p1 }
 0xc40   : > { %v2153_v16 = vpop.f32.mrf.mxu1 }
 0xc41   : > { %2166 = vrot.lane.b32.xlu0 %v2153_v16, %s3691_s2  ;;  %s2989_s2 = sshll.u32 %s3091_s26, 4  ;;  %s2990_s2 = int_to_ptr.vmem [resolvable:$false] %s2989_s2 }
 0xc42   : > { %v2665_v17 = vpop.f32.mrf.mxu1  ;;  %s2991_s23 = scalar_lea.vmem %s2990_s2, 256  ;;  %p2992_p10 = scmp.lt.s32.totalorder %s2306_s25, %s2990_s2 }
 0xc43   : > { %p2993_p6 = scmp.lt.s32.totalorder %s2991_s23, %s2985_s15 }
 0xc45   : > { %p2994_p12 = por %p2993_p6, %p2992_p10 }
 0xc47   : > { %p2995_p0 = pnand %p2994_p12, %p2988_p2 }
 0xcab   : > { %v2159_v18 = vpop.permute.xlu0 %2158 }
 0xcac   : > { %v2169_v11 = vsel %vm616_vm2, %v1925_v9, %v2159_v18 }
 0xcaf   : > { %v2163_v19 = vpop.permute.xlu1 %2162 }
 0xcb0   : > { %v2170_v20 = vsel %vm1290_vm3, %v2169_v11, %v2163_v19 }
 0xcb3   : > { %v2167_v21 = vpop.permute.xlu0 %2166 }
 0xcb4   : > { %v2171_v22 = vsel %vm1292_vm4, %v2170_v20, %v2167_v21 }
 0xcb5   : > { %2675 = vmatmul.mubr.msk.f32.vlgmr.msra.gmra.mxu0 %vm499_vm0, %v2171_v22 }
 0xd75   : > { %v2254_v25 = vpop.f32.mrf.mxu0 }
 0xd76   : > { %v2255_v26 = vadd.f32 %v2491_v24, %v2254_v25 }
 0xd77   : > { %v2676_v27 = vpop.f32.mrf.mxu0 }
 0xd78   : > { %v2258_v28 = vadd.f32 %v2255_v26, %v3498_v3  ;;  %v2495_v3 = vld [vmem:[%s3645_s9 + $0x1] ss:$0 sm:$0xff] }
 0xd7a   : > { %v2263_v29 = vsel %vm499_vm0, %v2258_v28, 0.0 }
 0xd7b   : > { %2264 = vadd.xlane.f32.xlu1 %v2263_v29 }
 0xe04   : > { %v2265_v30 = vpop.xlane.xlu1 %2264 }
 0xe05   : > { %v2266_v31 = vmul.f32 0.03125, %v2265_v30 }
 0xe07   : > { %v2267_v32 = vsub.f32 %v2258_v28, %v2266_v31 }
 0xe09   : > { %v2268_v33 = vmul.f32 %v2267_v32, %v2267_v32 }
 0xe0b   : > { %v2269_v34 = vsel %vm499_vm0, %v2268_v33, 0.0 }
 0xe0c   : > { %2270 = vadd.xlane.f32.xlu0 %v2269_v34 }
 0xe95   : > { %v2271_v36 = vpop.xlane.xlu0 %2270 }
 0xe96   : > { %v2272_v37 = vmul.f32 0.03125, %v2271_v36 }
 0xe98   : > { %v2273_v38 = vadd.f32 1e-12, %v2272_v37 }
 0xe9a   : > { %2823 = vrsqrt.f32 %v2273_v38 }
 0xea7   : > { %v2824_v39 = vpop.eup %2823 }
 0xea8   : > { %v2275_v40 = vmul.f32 %v2824_v39, %v2267_v32 }
 0xeaa   : > { %v2282_v42 = vmul.f32 %v2495_v3, %v2275_v40 }
 0xeac   : > { %v2289_v35 = vadd.f32 %v2496_v41, %v2282_v42 }
 0xeae   : > { %2290 = vst.msk [vmem:[%s492_s16] sm:$0xff] %vm499_vm0, %v2289_v35 }
 0xeaf   : > { %2998 = shalt.err (!%p2995_p0)
}
 0xeb0   : > { %s2999_s19 = scalar_lea.hbm %s2303_s7, 128  ;;  %s3003_s14 = scalar_lea.hbm %s3647_s11, 256 }
 0xeb1   : > { %p3000_p3 = scmp.ne.s32.totalorder %s2303_s7, %s2999_s19  ;;  %p3004_p5 = scmp.lt.s32.totalorder %s2303_s7, %s3647_s11 }
 0xeb2   : > { %p3005_p8 = scmp.lt.s32.totalorder %s3003_s14, %s2999_s19 }
 0xeb3   : > { %p3001_p13 = pnand %p3000_p3, %p3692_p7 }
 0xeb4   : > { %p3006_p9 = por %p3005_p8, %p3004_p5 }
 0xeb5   : > { %p3002_p4 = pneg %p3001_p13 }
 0xeb7   : > { %p3007_p11 = pnand %p3006_p9, %p3002_p4 }
 0xeb9   : > { %3010 = shalt.err (!%p3007_p11)
}
 0xeba   : > { %2697 = dma.vmem_to_hbm [thread:$0]  (%p3692_p7), %s2306_s25, 128, %s2303_s7, %s2292_s27  }
 0xebb PF: > { %s3693_s5 = sld [smem:[#allocation23_spill]]  ;;  %s2317_s4 = sand.u32 1, %s3053_s17  }
 0xebc   : > { %p3695_p2 = scmp.ge.s32.totalorder %s3065_s20, 2  ;;  %s2318_s24 = scalar_lea.sflag [#allocation4], %s2317_s4 }
 0xec1   : > { %p3694_p1 = scmp.ne.s32.totalorder %s3693_s5, 0 }
 0xec3   : > { %p2720_p10 = pnand %p3695_p2, %p3694_p1 }
 0xec5   : > { %p2721_p6 = pneg %p2720_p10 }
 0xec7   : > { %3048 = dma.done.wait (%p2721_p6), %s2318_s24, 128  }
 0xec8   : > { %3050 = vsyncadd (%p2721_p6), %s2318_s24, 4294967168  ;;  %s3696_s20 = sld [smem:[#allocation21_spill]]  ;;  %s3699_s17 = smov %s3057_s18 }
 0xec9   : > { %s3697_s16 = sld [smem:[#allocation20_spill]] }
 0xeca   : > { %s3698_s19 = sld [smem:[#allocation22_spill]] }
 0xece   : > { %p29_p12 = scmp.ge.s32.totalorder %s3696_s20, 4  }
 0xecf   : > { %s3700_s18 = smov %s3697_s16 }
 0xed0   :  { %31 = sbr.rel (!%p29_p12) target bundleno = 14 (0xe), region = 144 }
 0xed5   :  { %2323 = vsyncpa [#allocation3], 1 }
 0xed6   :  { %2325 = vsyncpa [#allocation3 + $0x1], 1 }
 0xed7   :  { %2326 = vsyncpa [#allocation6], 1 }
 0xed8   :  { %2328 = vsyncpa [#allocation6 + $0x1], 1 }
 0xed9   :  { %2329 = vsyncpa [#allocation9], 1 }
 0xeda   :  { %2330 = vsyncpa [#allocation12], 1 }
 0xedb   :  { %2331 = vsyncpa [#allocation4], 1 }
 0xedc   :  { %2333 = vsyncpa [#allocation4 + $0x1], 1 }

</bundles_post_ra>
